<compile_context>
chip_gen: v7x
topology: tpu7x:2x2x1
jax: 0.10.0
libtpu: 0.0.40
codegen_flags: <defaults>
</compile_context>

<pallas_src>
import jax
import jax.numpy as jnp
from jax.experimental import pallas as pl
from jax.experimental.pallas import tpu as pltpu


def _round_up(x, m):
    return ((x + m - 1) // m) * m


def _dinov2_tune_kernel(x_ref, wb_ref, bb_ref,
                        w1_ref, b1_ref, w2_ref, b2_ref,
                        out_ref, acc_ref):
    """K-tiled backbone projection + fused labels_head (Linear-ReLU-Linear-Softmax)."""
    k = pl.program_id(1)

    # ---- init accumulator at the start of each K reduction -----------------
    @pl.when(k == 0)
    def _():
        acc_ref[...] = jnp.zeros_like(acc_ref)

    # ---- backbone stand-in: accumulate x_tile @ wb_tile (bf16 MXU, f32 acc) -
    acc_ref[...] += jnp.dot(x_ref[...].astype(jnp.bfloat16), wb_ref[...],
                            preferred_element_type=jnp.float32)

    # ---- on the last K step: bias + head + softmax, write lane-dense slab --
    @pl.when(k == pl.num_programs(1) - 1)
    def _():
        feats = acc_ref[...] + bb_ref[...]                         # (TB, 1024) f32

        # labels_head[0] Linear(1024, 256) + [1] ReLU
        h = jnp.dot(feats.astype(jnp.bfloat16), w1_ref[...],
                    preferred_element_type=jnp.float32) + b1_ref[...]
        h = jnp.maximum(h, 0.0)                                    # (TB, 256) f32

        # labels_head[2] Linear(256, out_dim_padded)
        logits = jnp.dot(h.astype(jnp.bfloat16), w2_ref[...],
                         preferred_element_type=jnp.float32) + b2_ref[...]

        # labels_head[3] Softmax(dim=1); padded columns carry -1e30 bias -> 0
        m = jnp.max(logits, axis=1, keepdims=True)
        e = jnp.exp(logits - m)
        out_ref[...] = e / jnp.sum(e, axis=1, keepdims=True)


def dinov2_tune_forward(frame, params, *, tk=256, tb=128):
    """frame: (B, C, H, W) float32 NCHW.  Returns (B, out_dim) softmax probs."""
    B = frame.shape[0]
    x = frame.reshape(B, -1).astype(jnp.float32)                   # (B, Fin)
    Fin = x.shape[1]

    wb, bb = params["wb"], params["bb"]
    w1, b1 = params["w1"], params["b1"]
    w2, b2 = params["w2"], params["b2"]
    out_dim = w2.shape[1]

    # ---- padded / tiled sizes ----------------------------------------------
    tk = min(tk, _round_up(Fin, 128))            # lane-aligned K tile
    Kp = _round_up(Fin, tk)
    tb = min(tb, _round_up(B, 8))                # sublane-aligned batch tile
    Bp = _round_up(B, tb)
    OUTP = max(128, _round_up(out_dim, 128))     # lane-dense output slab

    # ---- pad operands (zero rows/cols do not change the math) ---------------
    x_p = jnp.pad(x, ((0, Bp - B), (0, Kp - Fin)))
    wb_p = jnp.pad(wb.astype(jnp.bfloat16), ((0, Kp - Fin), (0, 0)))
    bb_p = bb.astype(jnp.float32)
    w1_p = w1.astype(jnp.bfloat16)
    b1_p = b1.astype(jnp.float32)
    w2_p = jnp.pad(w2.astype(jnp.bfloat16), ((0, 0), (0, OUTP - out_dim)))
    # padded logit columns get -1e30 so exp() -> 0 and the softmax is exact.
    b2_p = jnp.pad(b2.astype(jnp.float32), ((0, 0), (0, OUTP - out_dim)),
                   constant_values=-1e30)

    grid = (Bp // tb, Kp // tk)

    cost = pl.CostEstimate(
        flops=2 * Bp * Kp * 1024 + 2 * Bp * 1024 * 256 + 2 * Bp * 256 * OUTP,
        transcendentals=Bp * OUTP,
        bytes_accessed=(x_p.size * 4 + wb_p.size * 2 + bb_p.size * 4 +
                        w1_p.size * 2 + b1_p.size * 4 +
                        w2_p.size * 2 + b2_p.size * 4 + Bp * OUTP * 4),
    )

    probs_padded = pl.pallas_call(
        _dinov2_tune_kernel,
        out_shape=jax.ShapeDtypeStruct((Bp, OUTP), jnp.float32),
        grid=grid,
        in_specs=[
            pl.BlockSpec((tb, tk),    lambda b, k: (b, k)),   # x tile
            pl.BlockSpec((tk, 1024),  lambda b, k: (k, 0)),   # wb tile (streamed)
            pl.BlockSpec((1, 1024),   lambda b, k: (0, 0)),   # bb  (resident)
            pl.BlockSpec((1024, 256), lambda b, k: (0, 0)),   # w1  (resident)
            pl.BlockSpec((1, 256),    lambda b, k: (0, 0)),   # b1  (resident)
            pl.BlockSpec((256, OUTP), lambda b, k: (0, 0)),   # w2  (resident)
            pl.BlockSpec((1, OUTP),   lambda b, k: (0, 0)),   # b2  (resident)
        ],
        out_specs=pl.BlockSpec((tb, OUTP), lambda b, k: (b, 0)),
        scratch_shapes=[pltpu.VMEM((tb, 1024), jnp.float32)],
        compiler_params=pltpu.CompilerParams(
            dimension_semantics=("parallel", "arbitrary")),
        cost_estimate=cost,
    )(x_p, wb_p, bb_p, w1_p, b1_p, w2_p, b2_p)

    return probs_padded[:B, :out_dim]


def init_params(key, fin, out_dim):
    """Deterministic synthetic parameters (shapes from the module __init__).

    Matmul weights are stored in bf16 (MXU path, half the HBM weight traffic);
    biases stay f32.
    """
    ks = jax.random.split(key, 6)
    scale = lambda n: 1.0 / jnp.sqrt(jnp.float32(n))
    return {
        # backbone stand-in projection: Fin -> 1024
        "wb": (jax.random.normal(ks[0], (fin, 1024), jnp.float32)
               * scale(fin)).astype(jnp.bfloat16),
        "bb": jax.random.normal(ks[1], (1, 1024), jnp.float32) * 0.01,
        # labels_head Linear(1024, 256)
        "w1": (jax.random.normal(ks[2], (1024, 256), jnp.float32)
               * scale(1024)).astype(jnp.bfloat16),
        "b1": jax.random.normal(ks[3], (1, 256), jnp.float32) * 0.01,
        # labels_head Linear(256, out_dim)
        "w2": (jax.random.normal(ks[4], (256, out_dim), jnp.float32)
               * scale(256)).astype(jnp.bfloat16),
        "b2": jax.random.normal(ks[5], (1, out_dim), jnp.float32) * 0.01,
    }


if __name__ == "__main__":
    key = jax.random.PRNGKey(0)
    k_frame, k_params = jax.random.split(key)

    B, C, H, W = 8, 3, 16, 16          # small NCHW frame
    OUT_DIM = 16

    frame = jax.random.normal(k_frame, (B, C, H, W), jnp.float32)
    params = init_params(k_params, C * H * W, OUT_DIM)

    probs = dinov2_tune_forward(frame, params)
    probs = jax.block_until_ready(probs)

    # sanity: shape and softmax rows sum to 1
    assert probs.shape == (B, OUT_DIM)
    assert jnp.allclose(jnp.sum(probs, axis=1), 1.0, atol=1e-5)
    assert bool(jnp.all(probs >= 0.0))

    print("KERNEL_OK")
</pallas_src>

<mosaic_0001>
module attributes {stable_mosaic.version = 11 : i64} {
  func.func @_dinov2_tune_kernel(%arg0: i32, %arg1: i32, %arg2: memref<8x256xf32, #tpu.memory_space<vmem>>, %arg3: memref<256x1024xbf16, #tpu.memory_space<vmem>>, %arg4: memref<1x1024xf32, #tpu.memory_space<vmem>>, %arg5: memref<1024x256xbf16, #tpu.memory_space<vmem>>, %arg6: memref<1x256xf32, #tpu.memory_space<vmem>>, %arg7: memref<256x128xbf16, #tpu.memory_space<vmem>>, %arg8: memref<1x128xf32, #tpu.memory_space<vmem>>, %arg9: memref<8x128xf32, #tpu.memory_space<vmem>>, %arg10: memref<8x1024xf32, #tpu.memory_space<vmem>>) attributes {dimension_semantics = [#tpu.dimension_semantics<parallel>, #tpu.dimension_semantics<arbitrary>], iteration_bounds = array<i64: 1, 3>, scalar_prefetch = 0 : i64, scratch_operands = 1 : i64, tpu.core_type = #tpu.core_type<tc>, window_params = [{transform_indices = @transform_0, window_bounds = array<i64: 8, 256>}, {transform_indices = @transform_1, window_bounds = array<i64: 256, 1024>}, {pipeline_mode = #tpu.pipeline_mode<synchronous>, transform_indices = @transform_2, window_bounds = array<i64: 1, 1024>}, {pipeline_mode = #tpu.pipeline_mode<synchronous>, transform_indices = @transform_3, window_bounds = array<i64: 1024, 256>}, {pipeline_mode = #tpu.pipeline_mode<synchronous>, transform_indices = @transform_4, window_bounds = array<i64: 1, 256>}, {pipeline_mode = #tpu.pipeline_mode<synchronous>, transform_indices = @transform_5, window_bounds = array<i64: 256, 128>}, {pipeline_mode = #tpu.pipeline_mode<synchronous>, transform_indices = @transform_6, window_bounds = array<i64: 1, 128>}, {transform_indices = @transform_7, window_bounds = array<i64: 8, 128>}]} {
    %c0_i32 = arith.constant 0 : i32
    %0 = arith.cmpi eq, %arg1, %c0_i32 : i32
    %1 = arith.extui %0 : i1 to i32
    %c0_i32_0 = arith.constant 0 : i32
    %2 = arith.cmpi ne, %1, %c0_i32_0 : i32
    scf.if %2 {
      %cst_9 = arith.constant 0.000000e+00 : f32
      %13 = vector.broadcast %cst_9 : f32 to vector<8x1024xf32>
      %c0_10 = arith.constant 0 : index
      %c0_11 = arith.constant 0 : index
      %14 = vector.load %arg10[%c0_10, %c0_11] : memref<8x1024xf32, #tpu.memory_space<vmem>>, vector<8x1024xf32>
      tpu.vector_store %arg10[%c0_10, %c0_11], %13 {strides = array<i32>} : memref<8x1024xf32, #tpu.memory_space<vmem>>, vector<8x1024xf32>,
    } else {
    }
    %c0 = arith.constant 0 : index
    %c0_1 = arith.constant 0 : index
    %3 = vector.load %arg10[%c0, %c0_1] : memref<8x1024xf32, #tpu.memory_space<vmem>>, vector<8x1024xf32>
    %c0_2 = arith.constant 0 : index
    %c0_3 = arith.constant 0 : index
    %4 = vector.load %arg2[%c0_2, %c0_3] : memref<8x256xf32, #tpu.memory_space<vmem>>, vector<8x256xf32>
    %5 = arith.truncf %4 : vector<8x256xf32> to vector<8x256xbf16>
    %c0_4 = arith.constant 0 : index
    %c0_5 = arith.constant 0 : index
    %6 = vector.load %arg3[%c0_4, %c0_5] : memref<256x1024xbf16, #tpu.memory_space<vmem>>, vector<256x1024xbf16>
    %cst = arith.constant dense<0.000000e+00> : vector<8x1024xf32>
    %7 = tpu.matmul %5, %6, %cst {dimension_numbers = #tpu.dot_dimension_numbers<[1], [0], [0], [1], [0, 0, 1, 1], [], []>} : vector<8x256xbf16>, vector<256x1024xbf16>, vector<8x1024xf32> -> vector<8x1024xf32>
    %8 = arith.addf %3, %7 : vector<8x1024xf32>
    %c0_6 = arith.constant 0 : index
    %c0_7 = arith.constant 0 : index
    %9 = vector.load %arg10[%c0_6, %c0_7] : memref<8x1024xf32, #tpu.memory_space<vmem>>, vector<8x1024xf32>
    tpu.vector_store %arg10[%c0_6, %c0_7], %8 {strides = array<i32>} : memref<8x1024xf32, #tpu.memory_space<vmem>>, vector<8x1024xf32>,
    %c2_i32 = arith.constant 2 : i32
    %10 = arith.cmpi eq, %arg1, %c2_i32 : i32
    %11 = arith.extui %10 : i1 to i32
    %c0_i32_8 = arith.constant 0 : i32
    %12 = arith.cmpi ne, %11, %c0_i32_8 : i32
    scf.if %12 {
      %c0_9 = arith.constant 0 : index
      %c0_10 = arith.constant 0 : index
      %13 = vector.load %arg10[%c0_9, %c0_10] : memref<8x1024xf32, #tpu.memory_space<vmem>>, vector<8x1024xf32>
      %c0_11 = arith.constant 0 : index
      %c0_12 = arith.constant 0 : index
      %14 = vector.load %arg4[%c0_11, %c0_12] : memref<1x1024xf32, #tpu.memory_space<vmem>>, vector<1x1024xf32>
      %15 = vector.broadcast %14 : vector<1x1024xf32> to vector<8x1024xf32>
      %16 = arith.addf %13, %15 : vector<8x1024xf32>
      %17 = arith.truncf %16 : vector<8x1024xf32> to vector<8x1024xbf16>
      %c0_13 = arith.constant 0 : index
      %c0_14 = arith.constant 0 : index
      %18 = vector.load %arg5[%c0_13, %c0_14] : memref<1024x256xbf16, #tpu.memory_space<vmem>>, vector<1024x256xbf16>
      %cst_15 = arith.constant dense<0.000000e+00> : vector<8x256xf32>
      %19 = tpu.matmul %17, %18, %cst_15 {dimension_numbers = #tpu.dot_dimension_numbers<[1], [0], [0], [1], [0, 0, 1, 1], [], []>} : vector<8x1024xbf16>, vector<1024x256xbf16>, vector<8x256xf32> -> vector<8x256xf32>
      %c0_16 = arith.constant 0 : index
      %c0_17 = arith.constant 0 : index
      %20 = vector.load %arg6[%c0_16, %c0_17] : memref<1x256xf32, #tpu.memory_space<vmem>>, vector<1x256xf32>
      %21 = vector.broadcast %20 : vector<1x256xf32> to vector<8x256xf32>
      %22 = arith.addf %19, %21 : vector<8x256xf32>
      %cst_18 = arith.constant 0.000000e+00 : f32
      %23 = vector.broadcast %cst_18 : f32 to vector<8x256xf32>
      %24 = arith.maximumf %22, %23 : vector<8x256xf32>
      %25 = arith.truncf %24 : vector<8x256xf32> to vector<8x256xbf16>
      %c0_19 = arith.constant 0 : index
      %c0_20 = arith.constant 0 : index
      %26 = vector.load %arg7[%c0_19, %c0_20] : memref<256x128xbf16, #tpu.memory_space<vmem>>, vector<256x128xbf16>
      %cst_21 = arith.constant dense<0.000000e+00> : vector<8x128xf32>
      %27 = tpu.matmul %25, %26, %cst_21 {dimension_numbers = #tpu.dot_dimension_numbers<[1], [0], [0], [1], [0, 0, 1, 1], [], []>} : vector<8x256xbf16>, vector<256x128xbf16>, vector<8x128xf32> -> vector<8x128xf32>
      %c0_22 = arith.constant 0 : index
      %c0_23 = arith.constant 0 : index
      %28 = vector.load %arg8[%c0_22, %c0_23] : memref<1x128xf32, #tpu.memory_space<vmem>>, vector<1x128xf32>
      %29 = vector.broadcast %28 : vector<1x128xf32> to vector<8x128xf32>
      %30 = arith.addf %27, %29 : vector<8x128xf32>
      %cst_24 = arith.constant dense<0xFF800000> : vector<8xf32>
      %31 = vector.multi_reduction <maximumf>, %30, %cst_24 [1] : vector<8x128xf32> to vector<8xf32>
      %32 = vector.shape_cast %31 : vector<8xf32> to vector<8x1xf32>
      %33 = vector.broadcast %32 : vector<8x1xf32> to vector<8x128xf32>
      %34 = arith.subf %30, %33 : vector<8x128xf32>
      %35 = math.exp %34 : vector<8x128xf32>
      %cst_25 = arith.constant dense<0.000000e+00> : vector<8xf32>
      %36 = vector.multi_reduction <add>, %35, %cst_25 [1] : vector<8x128xf32> to vector<8xf32>
      %37 = vector.shape_cast %36 : vector<8xf32> to vector<8x1xf32>
      %38 = vector.broadcast %37 : vector<8x1xf32> to vector<8x128xf32>
      %39 = arith.divf %35, %38 : vector<8x128xf32>
      %c0_26 = arith.constant 0 : index
      %c0_27 = arith.constant 0 : index
      %40 = vector.load %arg9[%c0_26, %c0_27] : memref<8x128xf32, #tpu.memory_space<vmem>>, vector<8x128xf32>
      tpu.vector_store %arg9[%c0_26, %c0_27], %39 {strides = array<i32>} : memref<8x128xf32, #tpu.memory_space<vmem>>, vector<8x128xf32>,
    } else {
    }
    return
  }
  func.func @transform_0(%arg0: i32, %arg1: i32) -> (i32, i32) {
    %c0_i32 = arith.constant 0 : i32
    return %arg0, %arg1 : i32, i32
  }
  func.func @transform_1(%arg0: i32, %arg1: i32) -> (i32, i32) {
    %c0_i32 = arith.constant 0 : i32
    %c0_i32_0 = arith.constant 0 : i32
    return %arg1, %c0_i32 : i32, i32
  }
  func.func @transform_2(%arg0: i32, %arg1: i32) -> (i32, i32) {
    %c0_i32 = arith.constant 0 : i32
    %c0_i32_0 = arith.constant 0 : i32
    %c0_i32_1 = arith.constant 0 : i32
    return %c0_i32, %c0_i32_0 : i32, i32
  }
  func.func @transform_3(%arg0: i32, %arg1: i32) -> (i32, i32) {
    %c0_i32 = arith.constant 0 : i32
    %c0_i32_0 = arith.constant 0 : i32
    %c0_i32_1 = arith.constant 0 : i32
    return %c0_i32, %c0_i32_0 : i32, i32
  }
  func.func @transform_4(%arg0: i32, %arg1: i32) -> (i32, i32) {
    %c0_i32 = arith.constant 0 : i32
    %c0_i32_0 = arith.constant 0 : i32
    %c0_i32_1 = arith.constant 0 : i32
    return %c0_i32, %c0_i32_0 : i32, i32
  }
  func.func @transform_5(%arg0: i32, %arg1: i32) -> (i32, i32) {
    %c0_i32 = arith.constant 0 : i32
    %c0_i32_0 = arith.constant 0 : i32
    %c0_i32_1 = arith.constant 0 : i32
    return %c0_i32, %c0_i32_0 : i32, i32
  }
  func.func @transform_6(%arg0: i32, %arg1: i32) -> (i32, i32) {
    %c0_i32 = arith.constant 0 : i32
    %c0_i32_0 = arith.constant 0 : i32
    %c0_i32_1 = arith.constant 0 : i32
    return %c0_i32, %c0_i32_0 : i32, i32
  }
  func.func @transform_7(%arg0: i32, %arg1: i32) -> (i32, i32) {
    %c0_i32 = arith.constant 0 : i32
    %c0_i32_0 = arith.constant 0 : i32
    return %arg0, %c0_i32 : i32, i32
  }
}

</mosaic_0001>

<bundles_post_ra>
// kernel: tpu_custom_call.1
= control target key start
LH: loop header
LB: loop body
LE: loop exit
PB: predicated region body
PF: predicated region fallthrough
CT: control target
= control target key end

     0   :  { %s4269_s0 = inlined_call_operand.hbm [shape: f32[8,768], index: 0, kind: input, shape index: {}]   ;;  %s4270_s1 = inlined_call_operand.hbm [shape: bf16[768,1024], index: 1, kind: input, shape index: {}]   ;;  %s4271_s2 = inlined_call_operand.hbm [shape: f32[1,1024], index: 2, kind: input, shape index: {}]   ;;  %s4272_s3 = inlined_call_operand.hbm [shape: bf16[1024,256], index: 3, kind: input, shape index: {}]   ;;  %s4273_s4 = inlined_call_operand.hbm [shape: f32[1,256], index: 4, kind: input, shape index: {}]   ;;  %s4274_s5 = inlined_call_operand.hbm [shape: bf16[256,128], index: 5, kind: input, shape index: {}]   ;;  %s4275_s6 = inlined_call_operand.hbm [shape: f32[1,128], index: 6, kind: input, shape index: {}]   ;;  %s4276_s7 = inlined_call_operand.hbm [shape: f32[8,128], index: 7, kind: output, shape index: {}]  }
   0x1   :  { %4280 = sst [smem:[#allocation22_spill]] %s4271_s2 }
   0x2   :  { %4281 = sst [smem:[#allocation23_spill]] %s4272_s3 }
   0x3   :  { %4282 = sst [smem:[#allocation24_spill]] %s4276_s7 }
   0x4   :  { %12 = vsyncpa [#allocation4], 0 }
   0x5   :  { %14 = vsyncpa [#allocation4 + $0x1], 0 }
   0x6   :  { %15 = vsyncpa [#allocation7], 0 }
   0x7   :  { %17 = vsyncpa [#allocation7 + $0x1], 0 }
   0x8   :  { %18 = vsyncpa [#allocation10], 0 }
   0x9   :  { %19 = vsyncpa [#allocation13], 0 }
   0xa   :  { %20 = vsyncpa [#allocation5], 0  ;;  %s3761_s24 = smov 0   ;;  %s3763_s25 = smov 0  }
   0xb   :  { %s3765_s26 = smov 0   ;;  %s3767_s27 = smov 0  }
   0xc   :  { %s3769_s28 = smov 0   ;;  %s3771_s29 = smov 0  }
   0xd LB: > { %s3792_s30 = sadd.s32 4294967295, %s3704_s29   ;;  %p2733_p0 = scmp.ge.s32.totalorder %s3704_s29, 1  ;;  %s3704_s29 = sphi %s3771_s29, %s26_s29   ;;  %s3700_s28 = sphi %s3769_s28, %s4304_s28   ;;  %s3696_s27 = sphi %s3767_s27, %s4303_s27   ;;  %s3692_s26 = sphi %s3765_s26, %s4302_s26   ;;  %s3688_s25 = sphi %s3763_s25, %s4301_s25   ;;  %s3684_s24 = sphi %s3761_s24, %s4300_s24  }
   0xe   : > { %p4277_p1 = scmp.eq.s32.totalorder %s3792_s30, 0  ;;  %p228_p2 = scmp.lt.s32.totalorder %s3704_s29, 4 }
   0xf   : > { %s3706_s9 = smov [#allocation8]   ;;  %s3707_s11 = smov [#allocation9]  }
  0x10   : > { %p3797_p3 = pnand %p2733_p0, %p228_p2  ;;  %s241_s10 = sshll.u32 %s3706_s9, 4  ;;  %s242_s10 = int_to_ptr.vmem [resolvable:$true] %s241_s10 }
  0x11   : > { %s251_s12 = sshll.u32 %s3707_s11, 4  ;;  %s3708_s14 = smov [#allocation12]   ;;  %s3809_s12 = int_to_ptr.vmem [resolvable:$true] %s251_s12 }
  0x12   : > { %s4283_s8 = scalar_select %p3797_p3, 1, 0 }
  0x13   : > { %p3099_p4 = pneg %p3797_p3  ;;  %s3811_s15 = sshll.u32 %s3708_s14, 4  ;;  %s276_s15 = int_to_ptr.vmem [resolvable:$true] %s3811_s15 }
  0x14   : > { %s4285_s2 = sld [smem:[#allocation22_spill]] }
  0x15   : > { %p3805_p5 = pnand %p3099_p4, %p4277_p1 }
  0x17   : > { %p3821_p7 = pneg %p3805_p5 }
  0x1a   : > { %s3408_s18 = scalar_lea.hbm %s4285_s2, 128 }
  0x1b   : > { %p3409_p6 = scmp.ne.s32.totalorder %s4285_s2, %s3408_s18  ;;  %p3415_p10 = scmp.lt.u32.totalorder %s3408_s18, %s4285_s2 }
  0x1d   : > { %p3411_p8 = pnand %p3821_p7, %p3409_p6 }
  0x1f   : > { %p3412_p9 = pneg %p3411_p8 }
  0x21   : > { %p3417_p11 = pnand %p3415_p10, %p3412_p9 }
  0x23   : > { %3420 = shalt.err (!%p3417_p11)
}
  0x24   : > { %s3421_s9 = scalar_lea.vmem %s242_s10, 128  ;;  %p3429_p2 = scmp.lt.s32.totalorder %s242_s10, %s242_s10 }
  0x25   : > { %p3422_p12 = scmp.ne.s32.totalorder %s242_s10, %s3421_s9  ;;  %p3430_p4 = scmp.lt.s32.totalorder %s3421_s9, %s3421_s9 }
  0x27   : > { %p3424_p13 = pnand %p3422_p12, %p3821_p7  ;;  %p3431_p1 = por %p3430_p4, %p3429_p2 }
  0x29   : > { %p3425_p0 = pneg %p3424_p13 }
  0x2b   : > { %p3432_p3 = pnand %p3431_p1, %p3425_p0 }
  0x2d   : > { %3435 = shalt.err (!%p3432_p3)
}
  0x2e   : > { %3102 = dma.hbm_to_vmem [thread:$0]  (!%p3805_p5), %s4285_s2, 128, %s242_s10, [#allocation7]  }
  0x2f   : > { %s4287_s3 = sld [smem:[#allocation23_spill]] }
  0x35   : > { %s3436_s18 = scalar_lea.hbm %s4287_s3, 16384 }
  0x36   : > { %p3437_p6 = scmp.ne.s32.totalorder %s4287_s3, %s3436_s18  ;;  %p3443_p1 = scmp.lt.u32.totalorder %s3436_s18, %s4287_s3 }
  0x38   : > { %p3439_p8 = pnand %p3437_p6, %p3821_p7 }
  0x3a   : > { %p3440_p9 = pneg %p3439_p8 }
  0x3c   : > { %p3445_p3 = pnand %p3443_p1, %p3440_p9 }
  0x3e   : > { %3448 = shalt.err (!%p3445_p3)
}
  0x3f   : > { %s3449_s10 = scalar_lea.vmem %s3809_s12, 16384  ;;  %p3457_p13 = scmp.lt.s32.totalorder %s3809_s12, %s3809_s12 }
  0x40   : > { %p3450_p10 = scmp.ne.s32.totalorder %s3809_s12, %s3449_s10  ;;  %p3458_p0 = scmp.lt.s32.totalorder %s3449_s10, %s3449_s10 }
  0x42   : > { %p3452_p11 = pnand %p3450_p10, %p3821_p7  ;;  %p3459_p2 = por %p3458_p0, %p3457_p13 }
  0x44   : > { %p3453_p12 = pneg %p3452_p11 }
  0x46   : > { %p3460_p4 = pnand %p3459_p2, %p3453_p12 }
  0x48   : > { %3463 = shalt.err (!%p3460_p4)
}
  0x49   : > { %s3709_s9 = smov 128   ;;  %s3710_s11 = smov 8  }
  0x4a   : > { %3105 = dma.hbm_to_vmem [thread:$0]  (!%p3805_p5), %s4287_s3, 16384, %s3809_s12, [#allocation10], %s3709_s9, %s3709_s9, %s3710_s11  }
  0x4b   : > { %s3464_s19 = scalar_lea.hbm %s4274_s5, 2048 }
  0x4c   : > { %p3465_p6 = scmp.ne.s32.totalorder %s4274_s5, %s3464_s19  ;;  %p3471_p1 = scmp.lt.u32.totalorder %s3464_s19, %s4274_s5 }
  0x4e   : > { %p3467_p8 = pnand %p3465_p6, %p3821_p7 }
  0x50   : > { %p3468_p9 = pneg %p3467_p8 }
  0x52   : > { %p3473_p3 = pnand %p3471_p1, %p3468_p9 }
  0x54   : > { %3476 = shalt.err (!%p3473_p3)
}
  0x55   : > { %s3477_s14 = scalar_lea.vmem %s276_s15, 2048  ;;  %p3485_p13 = scmp.lt.s32.totalorder %s276_s15, %s276_s15 }
  0x56   : > { %p3478_p10 = scmp.ne.s32.totalorder %s276_s15, %s3477_s14  ;;  %p3486_p0 = scmp.lt.s32.totalorder %s3477_s14, %s3477_s14 }
  0x58   : > { %p3480_p11 = pnand %p3478_p10, %p3821_p7  ;;  %p3487_p2 = por %p3486_p0, %p3485_p13 }
  0x5a   : > { %p3481_p12 = pneg %p3480_p11 }
  0x5c   : > { %p3488_p4 = pnand %p3487_p2, %p3481_p12 }
  0x5e   : > { %3491 = shalt.err (!%p3488_p4)
}
  0x5f   : > { %s3711_s12 = smov 64   ;;  %s3712_s9 = smov 4  }
  0x60   : > { %3111 = dma.hbm_to_vmem [thread:$0]  (!%p3805_p5), %s4274_s5, 2048, %s276_s15, [#allocation13], %s3711_s12, %s3711_s12, %s3712_s9  }
  0x61   : > { %s3713_s17 = smov [#allocation11]   ;;  %s3714_s19 = smov [#allocation14]  }
  0x62   : > { %s265_s18 = sshll.u32 %s3713_s17, 4  ;;  %s289_s20 = sshll.u32 %s3714_s19, 4  ;;  %s266_s18 = int_to_ptr.vmem [resolvable:$true] %s265_s18  ;;  %s290_s20 = int_to_ptr.vmem [resolvable:$true] %s289_s20 }
  0x63   : > { %s3492_s10 = scalar_lea.hbm %s4273_s4, 32 }
  0x64   : > { %p3493_p6 = scmp.ne.s32.totalorder %s4273_s4, %s3492_s10  ;;  %p3499_p1 = scmp.lt.u32.totalorder %s3492_s10, %s4273_s4 }
  0x66   : > { %p3495_p8 = pnand %p3493_p6, %p3821_p7 }
  0x68   : > { %p3496_p9 = pneg %p3495_p8 }
  0x6a   : > { %p3501_p3 = pnand %p3499_p1, %p3496_p9 }
  0x6c   : > { %3504 = shalt.err (!%p3501_p3)
}
  0x6d   : > { %s3505_s15 = scalar_lea.vmem %s266_s18, 32  ;;  %p3513_p13 = scmp.lt.s32.totalorder %s266_s18, %s266_s18 }
  0x6e   : > { %p3506_p10 = scmp.ne.s32.totalorder %s266_s18, %s3505_s15  ;;  %p3514_p0 = scmp.lt.s32.totalorder %s3505_s15, %s3505_s15 }
  0x70   : > { %p3508_p11 = pnand %p3506_p10, %p3821_p7  ;;  %p3515_p2 = por %p3514_p0, %p3513_p13 }
  0x72   : > { %p3509_p12 = pneg %p3508_p11 }
  0x74   : > { %p3516_p4 = pnand %p3515_p2, %p3509_p12 }
  0x76   : > { %3519 = shalt.err (!%p3516_p4)
}
  0x77   : > { %3108 = dma.hbm_to_vmem [thread:$0]  (!%p3805_p5), %s4273_s4, 32, %s266_s18, [#allocation10]  }
  0x78   : > { %s3520_s9 = scalar_lea.hbm %s4275_s6, 16 }
  0x79   : > { %p3521_p6 = scmp.ne.s32.totalorder %s4275_s6, %s3520_s9  ;;  %p3527_p1 = scmp.lt.u32.totalorder %s3520_s9, %s4275_s6 }
  0x7b   : > { %p3523_p8 = pnand %p3521_p6, %p3821_p7 }
  0x7d   : > { %p3524_p9 = pneg %p3523_p8 }
  0x7f   : > { %p3529_p3 = pnand %p3527_p1, %p3524_p9 }
  0x81   : > { %3532 = shalt.err (!%p3529_p3)
}
  0x82   : > { %s3533_s22 = scalar_lea.vmem %s290_s20, 16  ;;  %s3540_s18 = scalar_lea.vmem %s290_s20, 32 }
  0x83   : > { %p3534_p10 = scmp.ne.s32.totalorder %s290_s20, %s3533_s22  ;;  %p3541_p13 = scmp.lt.s32.totalorder %s290_s20, %s290_s20 }
  0x84   : > { %p3542_p0 = scmp.lt.s32.totalorder %s3540_s18, %s3533_s22 }
  0x85   : > { %p3536_p11 = pnand %p3534_p10, %p3821_p7 }
  0x86   : > { %p3543_p2 = por %p3542_p0, %p3541_p13 }
  0x87   : > { %p3537_p12 = pneg %p3536_p11 }
  0x89   : > { %p3544_p4 = pnand %p3543_p2, %p3537_p12 }
  0x8b   : > { %3547 = shalt.err (!%p3544_p4)
}
  0x8c   : > { %3114 = dma.hbm_to_vmem [thread:$0]  (!%p3805_p5), %s4275_s6, 16, %s290_s20, [#allocation13]  }
  0x8d   : > { %s35_s21 = sadd.s32 1, %s3700_s28  ;;  %s47_s13 = sadd.s32 1, %s3692_s26 }
  0x8e   : > { %p36_p7 = scmp.ge.s32.totalorder %s35_s21, 3  ;;  %p54_p6 = scmp.ne.s32.totalorder %s3692_s26, %s3688_s25 }
  0x8f   : > { %p55_p8 = scmp.eq.s32.totalorder %s3704_s29, 0  ;;  %p60_p1 = scmp.ne.s32.totalorder %s3688_s25, %s3684_s24 }
  0x90   : > { %s4306_s21 = smov (%p36_p7, %s35_s21), 0  ;;  %p3127_p3 = scmp.lt.s32.totalorder %s3704_s29, 3 }
  0x91   : > { %p3922_p9 = por %p55_p8, %p54_p6  ;;  %s43_s15 = ssub.s32 %s3700_s28, %s4306_s21 }
  0x92   : > { %p45_p10 = scmp.eq.s32.totalorder %s43_s15, 0  ;;  %p4289_p11 = scmp.eq.s32.totalorder %s3792_s30, 0 }
  0x93   : > { %s3938_s2 = sand.u32 1, %s3692_s26   ;;  %s3034_s12 = sshll.u32 %s3700_s28, 8 }
  0x94   : > { %p3933_p12 = por %p4289_p11, %p60_p1  ;;  %s2740_s7 = sshll.u32 %s3938_s2, 4 }
  0x95   : > { %s3942_s3 = scalar_select %p45_p10, %s3692_s26, %s47_s13  }
  0x96   : > { %s3948_s24 = scalar_lea.hbm %s4269_s0, %s3034_s12  ;;  %s304_s16 = scalar_lea.vmem [#allocation3], %s2740_s7 }
  0x97   : > { %s314_s17 = sshll.u32 %s304_s16, 4  ;;  %p3952_p5 = pnand %p3127_p3, %p3922_p9  ;;  %s3956_s17 = int_to_ptr.vmem [resolvable:$true] %s314_s17 }
  0x98   : > { %s2743_s22 = sshll.u32 %s3938_s2, 10  ;;  %s301_s18 = scalar_lea.sflag [#allocation4], %s3938_s2 }
  0x99   : > { %s3548_s23 = scalar_lea.hbm %s3948_s24, 256  ;;  %p3550_p0 = pneg %p3952_p5 }
  0x9a   : > { %p3549_p13 = scmp.ne.s32.totalorder %s3948_s24, %s3548_s23  ;;  %s3553_s14 = scalar_lea.hbm %s4269_s0, 768 }
  0x9b   : > { %p3554_p7 = scmp.lt.u32.totalorder %s3948_s24, %s4269_s0  ;;  %p3555_p6 = scmp.lt.u32.totalorder %s3553_s14, %s3548_s23 }
  0x9c   : > { %p3551_p2 = pnand %p3550_p0, %p3549_p13  ;;  %p3557_p9 = scmp.lt.u32.totalorder %s3548_s23, %s3948_s24 }
  0x9d   : > { %p3556_p8 = por %p3555_p6, %p3554_p7 }
  0x9e   : > { %p3552_p4 = pneg %p3551_p2 }
  0x9f   : > { %p3558_p1 = por %p3557_p9, %p3556_p8 }
  0xa1   : > { %p3559_p3 = pnand %p3558_p1, %p3552_p4 }
  0xa3   : > { %3562 = shalt.err (!%p3559_p3)
}
  0xa4   : > { %s3563_s7 = scalar_lea.vmem %s3956_s17, 256  ;;  %s3715_s9 = smov [#allocation3]  }
  0xa5   : > { %p3564_p10 = scmp.ne.s32.totalorder %s3956_s17, %s3563_s7  ;;  %s3568_s11 = sshll.u32 %s3715_s9, 4  ;;  %s3569_s11 = int_to_ptr.vmem [resolvable:$false] %s3568_s11 }
  0xa6   : > { %s3570_s16 = scalar_lea.vmem %s3569_s11, 512  ;;  %p3571_p2 = scmp.lt.s32.totalorder %s3956_s17, %s3569_s11 }
  0xa7   : > { %p3566_p11 = pnand %p3564_p10, %p3550_p0  ;;  %p3572_p7 = scmp.lt.s32.totalorder %s3570_s16, %s3563_s7 }
  0xa9   : > { %p3567_p13 = pneg %p3566_p11  ;;  %p3573_p6 = por %p3572_p7, %p3571_p2 }
  0xab   : > { %p3574_p8 = pnand %p3573_p6, %p3567_p13 }
  0xad   : > { %3577 = shalt.err (!%p3574_p8)
}
  0xae   : > { %3118 = dma.hbm_to_vmem [thread:$0]  (!%p3952_p5), %s3948_s24, 256, %s3956_s17, %s301_s18  }
  0xaf   : > { %s3036_s23 = sshll.u32 %s3700_s28, 14  ;;  %s325_s10 = scalar_lea.vmem [#allocation6], %s2743_s22 }
  0xb0   : > { %s333_s13 = sshll.u32 %s325_s10, 4  ;;  %s321_s14 = sand.u32 1, %s3704_s29   ;;  %s3988_s13 = int_to_ptr.vmem [resolvable:$true] %s333_s13 }
  0xb1   : > { %s3994_s7 = scalar_lea.hbm %s4270_s1, %s3036_s23  ;;  %s3996_s9 = scalar_lea.sflag [#allocation7], %s321_s14 }
  0xb2   : > { %s3578_s11 = scalar_lea.hbm %s3994_s7, 16384  ;;  %s3583_s17 = scalar_lea.hbm %s4270_s1, 49152 }
  0xb3   : > { %p3579_p4 = scmp.ne.s32.totalorder %s3994_s7, %s3578_s11  ;;  %p3584_p3 = scmp.lt.u32.totalorder %s3994_s7, %s4270_s1 }
  0xb4   : > { %p3585_p10 = scmp.lt.u32.totalorder %s3583_s17, %s3578_s11  ;;  %p3587_p13 = scmp.lt.u32.totalorder %s3578_s11, %s3994_s7 }
  0xb5   : > { %p3581_p9 = pnand %p3579_p4, %p3550_p0 }
  0xb6   : > { %p3586_p11 = por %p3585_p10, %p3584_p3 }
  0xb7   : > { %p3582_p1 = pneg %p3581_p9 }
  0xb8   : > { %p3588_p2 = por %p3587_p13, %p3586_p11 }
  0xba   : > { %p3589_p7 = pnand %p3588_p2, %p3582_p1 }
  0xbc   : > { %3592 = shalt.err (!%p3589_p7)
}
  0xbd   : > { %s3593_s16 = scalar_lea.vmem %s3988_s13, 16384  ;;  %s3716_s23 = smov [#allocation6]  }
  0xbe   : > { %p3594_p6 = scmp.ne.s32.totalorder %s3988_s13, %s3593_s16  ;;  %s3598_s10 = sshll.u32 %s3716_s23, 4  ;;  %s3599_s10 = int_to_ptr.vmem [resolvable:$false] %s3598_s10 }
  0xbf   : > { %s3600_s14 = scalar_lea.vmem %s3599_s10, 32768  ;;  %p3601_p9 = scmp.lt.s32.totalorder %s3988_s13, %s3599_s10 }
  0xc0   : > { %p3596_p8 = pnand %p3594_p6, %p3550_p0  ;;  %p3602_p3 = scmp.lt.s32.totalorder %s3600_s14, %s3593_s16 }
  0xc2   : > { %p3597_p4 = pneg %p3596_p8  ;;  %p3603_p10 = por %p3602_p3, %p3601_p9 }
  0xc4   : > { %p3604_p11 = pnand %p3603_p10, %p3597_p4 }
  0xc6   : > { %3607 = shalt.err (!%p3604_p11)
}
  0xc7   : > { %s3717_s15 = smov 512   ;;  %s3718_s12 = smov 32  }
  0xc8   : > { %3121 = dma.hbm_to_vmem [thread:$0]  (!%p3952_p5), %s3994_s7, 16384, %s3988_s13, %s3996_s9, %s3717_s15, %s3717_s15, %s3718_s12  }
  0xc9   : > { %p4292_p0 = scmp.ne.s32.totalorder %s4283_s8, 0 }
  0xca   : > { %s347_s11 = sand.u32 (!%p4292_p0), 1, %s3688_s25  }
  0xcb   : > { %345 = sbr.rel (%p4292_p0) target bundleno = 1445 (0x5a5), region = 48  ;;  %s2748_s2 = sshll.u32 (!%p4292_p0), %s347_s11, 4 }
  0xcc   : > { %s348_s24 = scalar_lea.sflag (!%p4292_p0), [#allocation4], %s347_s11  ;;  %s4025_s17 = scalar_lea.vmem (!%p4292_p0), [#allocation3], %s2748_s2 }
  0xd2   : > { %3659 = dma.done.wait (%p3933_p12), %s348_s24, 256  }
  0xd3   : > { %3661 = vsyncadd (%p3933_p12), %s348_s24, 4294967040  ;;  %s356_s22 = sand.u32 1, %s3792_s30   ;;  %s2749_s19 = sshll.u32 %s347_s11, 10 }
  0xd4   : > { %s357_s13 = scalar_lea.sflag [#allocation7], %s356_s22  ;;  %s4032_s7 = scalar_lea.vmem [#allocation6], %s2749_s19 }
  0xd5   : > { %3663 = dma.done.wait (%p3933_p12), %s357_s13, 16384  }
  0xd6   : > { %3665 = vsyncadd (%p3933_p12), %s357_s13, 4294950912  ;;  %p4293_p5 = scmp.eq.s32.totalorder %s3792_s30, 0 }
  0xd8   : > { %3667 = dma.done.wait (%p4293_p5), [#allocation7], 128   ;;  %p4294_p1 = pmov %p4293_p5 }
  0xda   : > { %3669 = vsyncadd (%p4294_p1), [#allocation7], 4294967168  ;;  %p4295_p13 = pmov %p4294_p1 }
  0xdb   : > { %p4296_p2 = pmov %p4294_p1 }
  0xdc   : > { %3671 = dma.done.wait (%p4295_p13), [#allocation10], 16416  }
  0xdd   : > { %3673 = vsyncadd (%p4296_p2), [#allocation10], 4294950880  ;;  %p4297_p7 = pmov %p4294_p1 }
  0xde   : > { %p4298_p6 = pmov %p4294_p1 }
  0xdf   : > { %3675 = dma.done.wait (%p4297_p7), [#allocation13], 2064  }
  0xe0   : > { %3677 = vsyncadd (%p4298_p6), [#allocation13], 4294965232  ;;  %p2755_p12 = scmp.ne.s32.totalorder %s3696_s27, 0 }
  0xe1   : > { %v3719_v0 = vmov (!%p2755_p12), 0.0  }
  0xe2   : > { %417 = sbr.rel (%p2755_p12) target bundleno = 233 (0xe9), region = 80  ;;  %418 = vst [vmem:[#allocation2] sm:$0xff] (!%p2755_p12), %v3719_v0  ;;  %419 = vst [vmem:[#allocation2 + $0x8] sm:$0xff] (!%p2755_p12), %v3719_v0 }
  0xe3   : > { %420 = vst [vmem:[#allocation2 + $0x10] sm:$0xff] (!%p2755_p12), %v3719_v0  ;;  %421 = vst [vmem:[#allocation2 + $0x18] sm:$0xff] (!%p2755_p12), %v3719_v0 }
  0xe4   : > { %422 = vst [vmem:[#allocation2 + $0x20] sm:$0xff] (!%p2755_p12), %v3719_v0  ;;  %423 = vst [vmem:[#allocation2 + $0x28] sm:$0xff] (!%p2755_p12), %v3719_v0 }
  0xe5   : > { %424 = vst [vmem:[#allocation2 + $0x30] sm:$0xff] (!%p2755_p12), %v3719_v0  ;;  %425 = vst [vmem:[#allocation2 + $0x38] sm:$0xff] (!%p2755_p12), %v3719_v0 }
  0xe9 PF: > { %v438_v1 = vld [vmem:[%s4032_s7] sm:$0xff]  ;;  %v439_v3 = vld [vmem:[%s4032_s7 + $0x8] sm:$0xff]  ;;  %p2884_p8 = scmp.ne.s32.totalorder %s3696_s27, 2 }
  0xea   : > { %v442_v2 = vld [vmem:[%s4032_s7 + $0x20] sm:$0xff]  ;;  %v443_v5 = vld [vmem:[%s4032_s7 + $0x28] sm:$0xff] }
  0xeb   : > { %v2757_v4 = vcombine.high %v438_v1, %v442_v2  ;;  %v2756_v6 = vcombine.low %v438_v1, %v442_v2  ;;  %v446_v7 = vld [vmem:[%s4032_s7 + $0x40] sm:$0xff]  ;;  %v2759_v9 = vcombine.high %v439_v3, %v443_v5  ;;  %v2758_v10 = vcombine.low %v439_v3, %v443_v5  ;;  %v447_v12 = vld [vmem:[%s4032_s7 + $0x48] sm:$0xff] }
  0xec   : > { %v450_v8 = vld [vmem:[%s4032_s7 + $0x60] sm:$0xff]  ;;  %v451_v13 = vld [vmem:[%s4032_s7 + $0x68] sm:$0xff] }
  0xed   : > { %v2765_v11 = vcombine.high %v446_v7, %v450_v8  ;;  %v454_v14 = vld [vmem:[%s4032_s7 + $0x80] sm:$0xff]  ;;  %1206 = vmatprep.subr.bf16.mxu0 %v2757_v4  ;;  %v2767_v15 = vcombine.high %v447_v12, %v451_v13  ;;  %v455_v17 = vld [vmem:[%s4032_s7 + $0x88] sm:$0xff]  ;;  %1247 = vmatprep.subr.bf16.mxu1 %v2759_v9  ;;  %v2764_v19 = vcombine.low %v446_v7, %v450_v8 }
  0xee   : > { %v458_v16 = vld [vmem:[%s4032_s7 + $0xa0] sm:$0xff]  ;;  %v459_v18 = vld [vmem:[%s4032_s7 + $0xa8] sm:$0xff]  ;;  %1207 = vmatpush1.bf16.msra.mxu0 %v2756_v6  ;;  %1248 = vmatpush1.bf16.msra.mxu1 %v2758_v10  ;;  %v2766_v20 = vcombine.low %v447_v12, %v451_v13 }
  0xef   : > { %1208 = vmatprep.subr.bf16.mxu0 %v2765_v11  ;;  %v2773_v21 = vcombine.high %v454_v14, %v458_v16  ;;  %1249 = vmatprep.subr.bf16.mxu1 %v2767_v15  ;;  %v2775_v22 = vcombine.high %v455_v17, %v459_v18  ;;  %v462_v23 = vld [vmem:[%s4032_s7 + $0xc0] sm:$0xff]  ;;  %v463_v25 = vld [vmem:[%s4032_s7 + $0xc8] sm:$0xff]  ;;  %v2772_v27 = vcombine.low %v454_v14, %v458_v16 }
  0xf0   : > { %v466_v24 = vld [vmem:[%s4032_s7 + $0xe0] sm:$0xff]  ;;  %v467_v26 = vld [vmem:[%s4032_s7 + $0xe8] sm:$0xff]  ;;  %v2774_v28 = vcombine.low %v455_v17, %v459_v18 }
  0xf1   : > { %v2781_v29 = vcombine.high %v462_v23, %v466_v24  ;;  %v2783_v30 = vcombine.high %v463_v25, %v467_v26  ;;  %v470_v31 = vld [vmem:[%s4032_s7 + $0x100] sm:$0xff]  ;;  %v471_v33 = vld [vmem:[%s4032_s7 + $0x108] sm:$0xff]  ;;  %v2780_v35 = vcombine.low %v462_v23, %v466_v24  ;;  %v2782_v36 = vcombine.low %v463_v25, %v467_v26 }
  0xf2   : > { %1209 = vmatpush1.bf16.msra.mxu0 %v2764_v19  ;;  %1250 = vmatpush1.bf16.msra.mxu1 %v2766_v20  ;;  %v474_v32 = vld [vmem:[%s4032_s7 + $0x120] sm:$0xff]  ;;  %v475_v34 = vld [vmem:[%s4032_s7 + $0x128] sm:$0xff] }
  0xf3   : > { %1210 = vmatprep.subr.bf16.mxu0 %v2773_v21  ;;  %1251 = vmatprep.subr.bf16.mxu1 %v2775_v22  ;;  %v2789_v37 = vcombine.high %v470_v31, %v474_v32  ;;  %v2791_v38 = vcombine.high %v471_v33, %v475_v34  ;;  %v478_v39 = vld [vmem:[%s4032_s7 + $0x140] sm:$0xff]  ;;  %v479_v41 = vld [vmem:[%s4032_s7 + $0x148] sm:$0xff]  ;;  %v2788_v43 = vcombine.low %v470_v31, %v474_v32 }
  0xf4   : > { %v482_v40 = vld [vmem:[%s4032_s7 + $0x160] sm:$0xff]  ;;  %v483_v42 = vld [vmem:[%s4032_s7 + $0x168] sm:$0xff]  ;;  %v2790_v44 = vcombine.low %v471_v33, %v475_v34 }
  0xf5   : > { %v2797_v45 = vcombine.high %v478_v39, %v482_v40  ;;  %v2799_v46 = vcombine.high %v479_v41, %v483_v42  ;;  %v486_v47 = vld [vmem:[%s4032_s7 + $0x180] sm:$0xff]  ;;  %v487_v49 = vld [vmem:[%s4032_s7 + $0x188] sm:$0xff]  ;;  %v2796_v51 = vcombine.low %v478_v39, %v482_v40  ;;  %v2798_v52 = vcombine.low %v479_v41, %v483_v42 }
  0xf6   : > { %1211 = vmatpush1.bf16.msra.mxu0 %v2772_v27  ;;  %1252 = vmatpush1.bf16.msra.mxu1 %v2774_v28  ;;  %v490_v48 = vld [vmem:[%s4032_s7 + $0x1a0] sm:$0xff]  ;;  %v491_v50 = vld [vmem:[%s4032_s7 + $0x1a8] sm:$0xff] }
  0xf7   : > { %1212 = vmatprep.subr.bf16.mxu0 %v2781_v29  ;;  %1253 = vmatprep.subr.bf16.mxu1 %v2783_v30  ;;  %v2805_v53 = vcombine.high %v486_v47, %v490_v48  ;;  %v435_v54 = vld [vmem:[%s4025_s17 + $0x8] sm:$0xff]  ;;  %v2807_v55 = vcombine.high %v487_v49, %v491_v50  ;;  %v494_v56 = vld [vmem:[%s4032_s7 + $0x1c0] sm:$0xff]  ;;  %v2804_v61 = vcombine.low %v486_v47, %v490_v48 }
  0xf8   : > { %v498_v57 = vld [vmem:[%s4032_s7 + $0x1e0] sm:$0xff]  ;;  %v4082_v58 = vpack.c.bf16 %v435_v54, %v435_v54  ;;  %v495_v59 = vld [vmem:[%s4032_s7 + $0x1c8] sm:$0xff]  ;;  %v2806_v62 = vcombine.low %v487_v49, %v491_v50 }
  0xf9   : > { %v499_v60 = vld [vmem:[%s4032_s7 + $0x1e8] sm:$0xff]  ;;  %v2813_v63 = vcombine.high %v494_v56, %v498_v57  ;;  %v502_v1 = vld [vmem:[%s4032_s7 + $0x200] sm:$0xff]  ;;  %v2812_v5 = vcombine.low %v494_v56, %v498_v57 }
  0xfa   : > { %1213 = vmatpush1.bf16.msra.mxu0 %v2780_v35  ;;  %1254 = vmatpush1.bf16.msra.mxu1 %v2782_v36  ;;  %v2815_v0 = vcombine.high %v495_v59, %v499_v60  ;;  %v506_v2 = vld [vmem:[%s4032_s7 + $0x220] sm:$0xff]  ;;  %v503_v3 = vld [vmem:[%s4032_s7 + $0x208] sm:$0xff]  ;;  %v2814_v6 = vcombine.low %v495_v59, %v499_v60 }
  0xfb   : > { %1214 = vmatprep.subr.bf16.mxu0 %v2789_v37  ;;  %1255 = vmatprep.subr.bf16.mxu1 %v2791_v38  ;;  %v507_v4 = vld [vmem:[%s4032_s7 + $0x228] sm:$0xff]  ;;  %v2821_v7 = vcombine.high %v502_v1, %v506_v2  ;;  %v510_v9 = vld [vmem:[%s4032_s7 + $0x240] sm:$0xff]  ;;  %v2820_v13 = vcombine.low %v502_v1, %v506_v2  ;;  %v440_v2 = vld [vmem:[%s4032_s7 + $0x10] sm:$0xff] }
  0xfc   : > { %1238 = vmatprep.mubr.bf16.mxu0 %v4082_v58  ;;  %1279 = vmatprep.mubr.bf16.mxu1 %v4082_v58  ;;  %v2823_v8 = vcombine.high %v503_v3, %v507_v4  ;;  %v514_v10 = vld [vmem:[%s4032_s7 + $0x260] sm:$0xff]  ;;  %v511_v11 = vld [vmem:[%s4032_s7 + $0x248] sm:$0xff]  ;;  %v2822_v14 = vcombine.low %v503_v3, %v507_v4  ;;  %v444_v3 = vld [vmem:[%s4032_s7 + $0x30] sm:$0xff] }
  0xfd   : > { %v515_v12 = vld [vmem:[%s4032_s7 + $0x268] sm:$0xff]  ;;  %v2829_v15 = vcombine.high %v510_v9, %v514_v10  ;;  %v518_v17 = vld [vmem:[%s4032_s7 + $0x280] sm:$0xff]  ;;  %v2828_v21 = vcombine.low %v510_v9, %v514_v10  ;;  %v441_v4 = vld [vmem:[%s4032_s7 + $0x18] sm:$0xff]  ;;  %v2761_v9 = vcombine.high %v440_v2, %v444_v3 }
  0xfe   : > { %1215 = vmatpush1.bf16.msra.mxu0 %v2788_v43  ;;  %1256 = vmatpush1.bf16.msra.mxu1 %v2790_v44  ;;  %v2831_v16 = vcombine.high %v511_v11, %v515_v12  ;;  %v522_v18 = vld [vmem:[%s4032_s7 + $0x2a0] sm:$0xff]  ;;  %v519_v19 = vld [vmem:[%s4032_s7 + $0x288] sm:$0xff]  ;;  %v2830_v22 = vcombine.low %v511_v11, %v515_v12  ;;  %v448_v11 = vld [vmem:[%s4032_s7 + $0x50] sm:$0xff] }
  0xff   : > { %1216 = vmatprep.subr.bf16.mxu0 %v2797_v45  ;;  %1257 = vmatprep.subr.bf16.mxu1 %v2799_v46  ;;  %v523_v20 = vld [vmem:[%s4032_s7 + $0x2a8] sm:$0xff]  ;;  %v2837_v23 = vcombine.high %v518_v17, %v522_v18  ;;  %v526_v25 = vld [vmem:[%s4032_s7 + $0x2c0] sm:$0xff]  ;;  %v2836_v29 = vcombine.low %v518_v17, %v522_v18  ;;  %v452_v12 = vld [vmem:[%s4032_s7 + $0x70] sm:$0xff] }
 0x100   : > { %v2839_v24 = vcombine.high %v519_v19, %v523_v20  ;;  %v530_v26 = vld [vmem:[%s4032_s7 + $0x2e0] sm:$0xff]  ;;  %v527_v27 = vld [vmem:[%s4032_s7 + $0x2c8] sm:$0xff]  ;;  %v2838_v30 = vcombine.low %v519_v19, %v523_v20  ;;  %v2769_v18 = vcombine.high %v448_v11, %v452_v12  ;;  %v456_v20 = vld [vmem:[%s4032_s7 + $0x90] sm:$0xff] }
 0x101   : > { %v531_v28 = vld [vmem:[%s4032_s7 + $0x2e8] sm:$0xff]  ;;  %v2845_v31 = vcombine.high %v526_v25, %v530_v26  ;;  %v534_v33 = vld [vmem:[%s4032_s7 + $0x300] sm:$0xff]  ;;  %v2844_v37 = vcombine.low %v526_v25, %v530_v26 }
 0x102   : > { %1217 = vmatpush1.bf16.msra.mxu0 %v2796_v51  ;;  %1258 = vmatpush1.bf16.msra.mxu1 %v2798_v52  ;;  %v2847_v32 = vcombine.high %v527_v27, %v531_v28  ;;  %v538_v34 = vld [vmem:[%s4032_s7 + $0x320] sm:$0xff]  ;;  %v535_v35 = vld [vmem:[%s4032_s7 + $0x308] sm:$0xff]  ;;  %v2846_v38 = vcombine.low %v527_v27, %v531_v28  ;;  %v464_v28 = vld [vmem:[%s4032_s7 + $0xd0] sm:$0xff] }
 0x103   : > { %1218 = vmatprep.subr.bf16.mxu0 %v2805_v53  ;;  %1259 = vmatprep.subr.bf16.mxu1 %v2807_v55  ;;  %v539_v36 = vld [vmem:[%s4032_s7 + $0x328] sm:$0xff]  ;;  %v2853_v39 = vcombine.high %v534_v33, %v538_v34  ;;  %v542_v41 = vld [vmem:[%s4032_s7 + $0x340] sm:$0xff]  ;;  %v2852_v45 = vcombine.low %v534_v33, %v538_v34 }
 0x104   : > { %v2855_v40 = vcombine.high %v535_v35, %v539_v36  ;;  %v546_v42 = vld [vmem:[%s4032_s7 + $0x360] sm:$0xff]  ;;  %v543_v43 = vld [vmem:[%s4032_s7 + $0x348] sm:$0xff]  ;;  %v2854_v46 = vcombine.low %v535_v35, %v539_v36  ;;  %v472_v36 = vld [vmem:[%s4032_s7 + $0x110] sm:$0xff] }
 0x105   : > { %v547_v44 = vld [vmem:[%s4032_s7 + $0x368] sm:$0xff]  ;;  %v2861_v47 = vcombine.high %v542_v41, %v546_v42  ;;  %v550_v49 = vld [vmem:[%s4032_s7 + $0x380] sm:$0xff]  ;;  %v2860_v53 = vcombine.low %v542_v41, %v546_v42 }
 0x106   : > { %1219 = vmatpush1.bf16.msra.mxu0 %v2804_v61  ;;  %1260 = vmatpush1.bf16.msra.mxu1 %v2806_v62  ;;  %v2863_v48 = vcombine.high %v543_v43, %v547_v44  ;;  %v554_v50 = vld [vmem:[%s4032_s7 + $0x3a0] sm:$0xff]  ;;  %v551_v51 = vld [vmem:[%s4032_s7 + $0x388] sm:$0xff]  ;;  %v2862_v54 = vcombine.low %v543_v43, %v547_v44  ;;  %v480_v43 = vld [vmem:[%s4032_s7 + $0x150] sm:$0xff] }
 0x107   : > { %1220 = vmatprep.subr.bf16.mxu0 %v2813_v63  ;;  %1261 = vmatprep.subr.bf16.mxu1 %v2815_v0  ;;  %v555_v52 = vld [vmem:[%s4032_s7 + $0x3a8] sm:$0xff]  ;;  %v2869_v55 = vcombine.high %v550_v49, %v554_v50  ;;  %v558_v57 = vld [vmem:[%s4032_s7 + $0x3c0] sm:$0xff]  ;;  %v2868_v62 = vcombine.low %v550_v49, %v554_v50  ;;  %v484_v44 = vld [vmem:[%s4032_s7 + $0x170] sm:$0xff] }
 0x108   : > { %v2871_v56 = vcombine.high %v551_v51, %v555_v52  ;;  %v562_v59 = vld [vmem:[%s4032_s7 + $0x3e0] sm:$0xff]  ;;  %v559_v60 = vld [vmem:[%s4032_s7 + $0x3c8] sm:$0xff]  ;;  %v2870_v63 = vcombine.low %v551_v51, %v555_v52  ;;  %v2801_v49 = vcombine.high %v480_v43, %v484_v44  ;;  %v488_v51 = vld [vmem:[%s4032_s7 + $0x190] sm:$0xff] }
 0x109   : > { %v563_v61 = vld [vmem:[%s4032_s7 + $0x3e8] sm:$0xff]  ;;  %v2877_v0 = vcombine.high %v558_v57, %v562_v59  ;;  %v492_v52 = vld [vmem:[%s4032_s7 + $0x1b0] sm:$0xff] }
 0x10a   : > { %1221 = vmatpush1.bf16.msra.mxu0 %v2812_v5  ;;  %1262 = vmatpush1.bf16.msra.mxu1 %v2814_v6  ;;  %v2879_v1 = vcombine.high %v559_v60, %v563_v61  ;;  %v445_v5 = vld [vmem:[%s4032_s7 + $0x38] sm:$0xff]  ;;  %v2876_v6 = vcombine.low %v558_v57, %v562_v59  ;;  %v2809_v57 = vcombine.high %v488_v51, %v492_v52 }
 0x10b   : > { %1222 = vmatprep.subr.bf16.mxu0 %v2821_v7  ;;  %1263 = vmatprep.subr.bf16.mxu1 %v2823_v8  ;;  %v434_v7 = vld [vmem:[%s4025_s17] sm:$0xff]  ;;  %v2878_v8 = vcombine.low %v559_v60, %v563_v61  ;;  %v2763_v10 = vcombine.high %v441_v4, %v445_v5  ;;  %v2762_v17 = vcombine.low %v441_v4, %v445_v5 }
 0x10c   : > { %v496_v60 = vld [vmem:[%s4032_s7 + $0x1d0] sm:$0xff] }
 0x10d   : > { %v500_v61 = vld [vmem:[%s4032_s7 + $0x1f0] sm:$0xff] }
 0x10e   : > { %1223 = vmatpush1.bf16.msra.mxu0 %v2820_v13  ;;  %1264 = vmatpush1.bf16.msra.mxu1 %v2822_v14  ;;  %v4127_v13 = vpack.c.bf16 %v434_v7, %v434_v7  ;;  %v449_v14 = vld [vmem:[%s4032_s7 + $0x58] sm:$0xff]  ;;  %v504_v4 = vld [vmem:[%s4032_s7 + $0x210] sm:$0xff] }
 0x10f   : > { %1224 = vmatprep.subr.bf16.mxu0 %v2829_v15  ;;  %1265 = vmatprep.subr.bf16.mxu1 %v2831_v16  ;;  %v453_v15 = vld [vmem:[%s4032_s7 + $0x78] sm:$0xff]  ;;  %v2760_v16 = vcombine.low %v440_v2, %v444_v3  ;;  %v2817_v2 = vcombine.high %v496_v60, %v500_v61  ;;  %v508_v5 = vld [vmem:[%s4032_s7 + $0x230] sm:$0xff] }
 0x110   : > { %v2771_v19 = vcombine.high %v449_v14, %v453_v15  ;;  %v2770_v25 = vcombine.low %v449_v14, %v453_v15  ;;  %v509_v7 = vld [vmem:[%s4032_s7 + $0x238] sm:$0xff]  ;;  %v516_v14 = vld [vmem:[%s4032_s7 + $0x270] sm:$0xff] }
 0x111   : > { %v513_v15 = vld [vmem:[%s4032_s7 + $0x258] sm:$0xff] }
 0x112   : > { %1225 = vmatpush1.bf16.msra.mxu0 %v2828_v21  ;;  %1266 = vmatpush1.bf16.msra.mxu1 %v2830_v22  ;;  %v460_v21 = vld [vmem:[%s4032_s7 + $0xb0] sm:$0xff]  ;;  %v457_v22 = vld [vmem:[%s4032_s7 + $0x98] sm:$0xff] }
 0x113   : > { %1226 = vmatprep.subr.bf16.mxu0 %v2837_v23  ;;  %1267 = vmatprep.subr.bf16.mxu1 %v2839_v24  ;;  %v461_v23 = vld [vmem:[%s4032_s7 + $0xb8] sm:$0xff]  ;;  %v2768_v24 = vcombine.low %v448_v11, %v452_v12  ;;  %v2777_v26 = vcombine.high %v456_v20, %v460_v21  ;;  %v512_v12 = vld [vmem:[%s4032_s7 + $0x250] sm:$0xff] }
 0x114   : > { %v2779_v27 = vcombine.high %v457_v22, %v461_v23  ;;  %v2778_v33 = vcombine.low %v457_v22, %v461_v23  ;;  %v524_v22 = vld [vmem:[%s4032_s7 + $0x2b0] sm:$0xff]  ;;  %v521_v23 = vld [vmem:[%s4032_s7 + $0x298] sm:$0xff] }
 0x116   : > { %1227 = vmatpush1.bf16.msra.mxu0 %v2836_v29  ;;  %1268 = vmatpush1.bf16.msra.mxu1 %v2838_v30  ;;  %v468_v29 = vld [vmem:[%s4032_s7 + $0xf0] sm:$0xff]  ;;  %v465_v30 = vld [vmem:[%s4032_s7 + $0xd8] sm:$0xff] }
 0x117   : > { %1228 = vmatprep.subr.bf16.mxu0 %v2845_v31  ;;  %1269 = vmatprep.subr.bf16.mxu1 %v2847_v32  ;;  %v469_v31 = vld [vmem:[%s4032_s7 + $0xf8] sm:$0xff]  ;;  %v2776_v32 = vcombine.low %v456_v20, %v460_v21  ;;  %v2785_v34 = vcombine.high %v464_v28, %v468_v29  ;;  %v520_v21 = vld [vmem:[%s4032_s7 + $0x290] sm:$0xff] }
 0x118   : > { %v2787_v35 = vcombine.high %v465_v30, %v469_v31 }
 0x11a   : > { %1229 = vmatpush1.bf16.msra.mxu0 %v2844_v37  ;;  %1270 = vmatpush1.bf16.msra.mxu1 %v2846_v38  ;;  %v476_v37 = vld [vmem:[%s4032_s7 + $0x130] sm:$0xff]  ;;  %v473_v38 = vld [vmem:[%s4032_s7 + $0x118] sm:$0xff] }
 0x11b   : > { %1230 = vmatprep.subr.bf16.mxu0 %v2853_v39  ;;  %1271 = vmatprep.subr.bf16.mxu1 %v2855_v40  ;;  %v477_v39 = vld [vmem:[%s4032_s7 + $0x138] sm:$0xff]  ;;  %v2784_v40 = vcombine.low %v464_v28, %v468_v29  ;;  %v2793_v41 = vcombine.high %v472_v36, %v476_v37  ;;  %v528_v29 = vld [vmem:[%s4032_s7 + $0x2d0] sm:$0xff] }
 0x11c   : > { %v2795_v42 = vcombine.high %v473_v38, %v477_v39 }
 0x11e   : > { %1231 = vmatpush1.bf16.msra.mxu0 %v2852_v45  ;;  %1272 = vmatpush1.bf16.msra.mxu1 %v2854_v46  ;;  %v481_v45 = vld [vmem:[%s4032_s7 + $0x158] sm:$0xff] }
 0x11f   : > { %1232 = vmatprep.subr.bf16.mxu0 %v2861_v47  ;;  %1273 = vmatprep.subr.bf16.mxu1 %v2863_v48  ;;  %v485_v46 = vld [vmem:[%s4032_s7 + $0x178] sm:$0xff]  ;;  %v2792_v47 = vcombine.low %v472_v36, %v476_v37  ;;  %v2794_v48 = vcombine.low %v473_v38, %v477_v39  ;;  %v536_v37 = vld [vmem:[%s4032_s7 + $0x310] sm:$0xff] }
 0x120   : > { %v2803_v50 = vcombine.high %v481_v45, %v485_v46  ;;  %v540_v38 = vld [vmem:[%s4032_s7 + $0x330] sm:$0xff]  ;;  %v537_v39 = vld [vmem:[%s4032_s7 + $0x318] sm:$0xff] }
 0x122   : > { %1233 = vmatpush1.bf16.msra.mxu0 %v2860_v53  ;;  %1274 = vmatpush1.bf16.msra.mxu1 %v2862_v54  ;;  %v489_v53 = vld [vmem:[%s4032_s7 + $0x198] sm:$0xff] }
 0x123   : > { %1234 = vmatprep.subr.bf16.mxu0 %v2869_v55  ;;  %1275 = vmatprep.subr.bf16.mxu1 %v2871_v56  ;;  %v493_v54 = vld [vmem:[%s4032_s7 + $0x1b8] sm:$0xff]  ;;  %v2800_v55 = vcombine.low %v480_v43, %v484_v44  ;;  %v2802_v56 = vcombine.low %v481_v45, %v485_v46  ;;  %v544_v44 = vld [vmem:[%s4032_s7 + $0x350] sm:$0xff] }
 0x124   : > { %v2811_v59 = vcombine.high %v489_v53, %v493_v54  ;;  %v548_v45 = vld [vmem:[%s4032_s7 + $0x370] sm:$0xff]  ;;  %v545_v46 = vld [vmem:[%s4032_s7 + $0x358] sm:$0xff] }
 0x126   : > { %1235 = vmatpush1.bf16.msra.mxu0 %v2868_v62  ;;  %1276 = vmatpush1.bf16.msra.mxu1 %v2870_v63  ;;  %v497_v62 = vld [vmem:[%s4032_s7 + $0x1d8] sm:$0xff] }
 0x127   : > { %1236 = vmatprep.subr.bf16.mxu0 %v2877_v0  ;;  %1277 = vmatprep.subr.bf16.mxu1 %v2879_v1  ;;  %v501_v63 = vld [vmem:[%s4032_s7 + $0x1f8] sm:$0xff]  ;;  %v2808_v0 = vcombine.low %v488_v51, %v492_v52  ;;  %v2810_v1 = vcombine.low %v489_v53, %v493_v54  ;;  %v552_v52 = vld [vmem:[%s4032_s7 + $0x390] sm:$0xff] }
 0x128   : > { %v2819_v3 = vcombine.high %v497_v62, %v501_v63  ;;  %v556_v53 = vld [vmem:[%s4032_s7 + $0x3b0] sm:$0xff]  ;;  %v553_v54 = vld [vmem:[%s4032_s7 + $0x398] sm:$0xff] }
 0x12a   : > { %1237 = vmatpush1.bf16.msra.mxu0 %v2876_v6  ;;  %1278 = vmatpush1.bf16.msra.mxu1 %v2878_v8  ;;  %v505_v6 = vld [vmem:[%s4032_s7 + $0x218] sm:$0xff]  ;;  %v2816_v8 = vcombine.low %v496_v60, %v500_v61  ;;  %v560_v61 = vld [vmem:[%s4032_s7 + $0x3d0] sm:$0xff] }
 0x12b   : > { %1288 = vmatprep.subr.bf16.mxu0 %v2761_v9  ;;  %1329 = vmatprep.subr.bf16.mxu1 %v2763_v10  ;;  %v2818_v9 = vcombine.low %v497_v62, %v501_v63  ;;  %v2825_v10 = vcombine.high %v504_v4, %v508_v5  ;;  %v2827_v11 = vcombine.high %v505_v6, %v509_v7  ;;  %v564_v62 = vld [vmem:[%s4032_s7 + $0x3f0] sm:$0xff]  ;;  %v561_v63 = vld [vmem:[%s4032_s7 + $0x3d8] sm:$0xff] }
 0x12d   : > { %1239 = vmatmul.mubr.bf16.vlgmr.msra.gmra.mrb[0].mxu0 %v4127_v13  ;;  %1280 = vmatmul.mubr.bf16.vlgmr.msra.gmra.mrb[0].mxu1 %v4127_v13 }
 0x12e   : > { %1289 = vmatpush1.bf16.msra.mxu0 %v2760_v16  ;;  %1330 = vmatpush1.bf16.msra.mxu1 %v2762_v17  ;;  %v517_v16 = vld [vmem:[%s4032_s7 + $0x278] sm:$0xff]  ;;  %v2824_v17 = vcombine.low %v504_v4, %v508_v5  ;;  %v2880_v5 = vcombine.low %v560_v61, %v564_v62 }
 0x12f   : > { %1290 = vmatprep.subr.bf16.mxu0 %v2769_v18  ;;  %1331 = vmatprep.subr.bf16.mxu1 %v2771_v19  ;;  %v2826_v18 = vcombine.low %v505_v6, %v509_v7  ;;  %v2833_v19 = vcombine.high %v512_v12, %v516_v14  ;;  %v2835_v20 = vcombine.high %v513_v15, %v517_v16  ;;  %v426_v7 = vld [vmem:[#allocation2] sm:$0xff] }
 0x130   : > { %1320 = vmatprep.mubr.bf16.mxu0 %v4082_v58  ;;  %1361 = vmatprep.mubr.bf16.mxu1 %v4082_v58  ;;  %v2786_v58 = vcombine.low %v465_v30, %v469_v31  ;;  %v532_v30 = vld [vmem:[%s4032_s7 + $0x2f0] sm:$0xff]  ;;  %v529_v31 = vld [vmem:[%s4032_s7 + $0x2d8] sm:$0xff] }
 0x132   : > { %1291 = vmatpush1.bf16.msra.mxu0 %v2768_v24  ;;  %1332 = vmatpush1.bf16.msra.mxu1 %v2770_v25  ;;  %v525_v24 = vld [vmem:[%s4032_s7 + $0x2b8] sm:$0xff]  ;;  %v2832_v25 = vcombine.low %v512_v12, %v516_v14 }
 0x133   : > { %1292 = vmatprep.subr.bf16.mxu0 %v2777_v26  ;;  %1333 = vmatprep.subr.bf16.mxu1 %v2779_v27  ;;  %v2834_v26 = vcombine.low %v513_v15, %v517_v16  ;;  %v2841_v27 = vcombine.high %v520_v21, %v524_v22  ;;  %v2843_v28 = vcombine.high %v521_v23, %v525_v24 }
 0x136   : > { %1293 = vmatpush1.bf16.msra.mxu0 %v2776_v32  ;;  %1334 = vmatpush1.bf16.msra.mxu1 %v2778_v33  ;;  %v533_v32 = vld [vmem:[%s4032_s7 + $0x2f8] sm:$0xff]  ;;  %v2840_v33 = vcombine.low %v520_v21, %v524_v22 }
 0x137   : > { %1294 = vmatprep.subr.bf16.mxu0 %v2785_v34  ;;  %1335 = vmatprep.subr.bf16.mxu1 %v2787_v35  ;;  %v2842_v34 = vcombine.low %v521_v23, %v525_v24  ;;  %v2849_v35 = vcombine.high %v528_v29, %v532_v30  ;;  %v2851_v36 = vcombine.high %v529_v31, %v533_v32  ;;  %v432_v24 = vld [vmem:[#allocation2 + $0x30] sm:$0xff] }
 0x13a   : > { %1295 = vmatpush1.bf16.msra.mxu0 %v2784_v40  ;;  %1336 = vmatpush1.bf16.msra.mxu1 %v2786_v58  ;;  %v541_v40 = vld [vmem:[%s4032_s7 + $0x338] sm:$0xff]  ;;  %v2848_v58 = vcombine.low %v528_v29, %v532_v30 }
 0x13b   : > { %1296 = vmatprep.subr.bf16.mxu0 %v2793_v41  ;;  %1337 = vmatprep.subr.bf16.mxu1 %v2795_v42  ;;  %v2850_v41 = vcombine.low %v529_v31, %v533_v32  ;;  %v2857_v42 = vcombine.high %v536_v37, %v540_v38  ;;  %v2859_v43 = vcombine.high %v537_v39, %v541_v40 }
 0x13e   : > { %1297 = vmatpush1.bf16.msra.mxu0 %v2792_v47  ;;  %1338 = vmatpush1.bf16.msra.mxu1 %v2794_v48  ;;  %v549_v47 = vld [vmem:[%s4032_s7 + $0x378] sm:$0xff]  ;;  %v2856_v48 = vcombine.low %v536_v37, %v540_v38 }
 0x13f   : > { %1298 = vmatprep.subr.bf16.mxu0 %v2801_v49  ;;  %1339 = vmatprep.subr.bf16.mxu1 %v2803_v50  ;;  %v2858_v49 = vcombine.low %v537_v39, %v541_v40  ;;  %v2865_v50 = vcombine.high %v544_v44, %v548_v45  ;;  %v2867_v51 = vcombine.high %v545_v46, %v549_v47  ;;  %v3196_v39 = vld [vmem:[#allocation9 + $0x4] ss:$8 sps:$4 sm:$0xff] (!%p2884_p8)  }
 0x140   : > { %v3198_v40 = vld [vmem:[#allocation9 + $0x204] ss:$8 sps:$4 sm:$0xff] (!%p2884_p8)  }
 0x142   : > { %1299 = vmatpush1.bf16.msra.mxu0 %v2800_v55  ;;  %1340 = vmatpush1.bf16.msra.mxu1 %v2802_v56  ;;  %v557_v55 = vld [vmem:[%s4032_s7 + $0x3b8] sm:$0xff]  ;;  %v2864_v56 = vcombine.low %v544_v44, %v548_v45 }
 0x143   : > { %1300 = vmatprep.subr.bf16.mxu0 %v2809_v57  ;;  %1341 = vmatprep.subr.bf16.mxu1 %v2811_v59  ;;  %v2866_v57 = vcombine.low %v545_v46, %v549_v47  ;;  %v2873_v59 = vcombine.high %v552_v52, %v556_v53  ;;  %v2875_v60 = vcombine.high %v553_v54, %v557_v55  ;;  %v3206_v44 = vld [vmem:[#allocation9 + $0x10] ss:$8 sps:$4 sm:$0xff] (!%p2884_p8)   ;;  %v3208_v46 = vld [vmem:[#allocation9 + $0x24] ss:$8 sps:$4 sm:$0xff] (!%p2884_p8)  }
 0x144   : > { %v3207_v45 = vld [vmem:[#allocation9 + $0x210] ss:$8 sps:$4 sm:$0xff] (!%p2884_p8)   ;;  %v3210_v47 = vld [vmem:[#allocation9 + $0x224] ss:$8 sps:$4 sm:$0xff] (!%p2884_p8)  }
 0x146   : > { %1301 = vmatpush1.bf16.msra.mxu0 %v2808_v0  ;;  %1342 = vmatpush1.bf16.msra.mxu1 %v2810_v1  ;;  %v565_v0 = vld [vmem:[%s4032_s7 + $0x3f8] sm:$0xff]  ;;  %v2872_v1 = vcombine.low %v552_v52, %v556_v53 }
 0x147   : > { %1302 = vmatprep.subr.bf16.mxu0 %v2817_v2  ;;  %1343 = vmatprep.subr.bf16.mxu1 %v2819_v3  ;;  %v2874_v2 = vcombine.low %v553_v54, %v557_v55  ;;  %v2881_v3 = vcombine.high %v560_v61, %v564_v62  ;;  %v2883_v4 = vcombine.high %v561_v63, %v565_v0  ;;  %v3218_v52 = vld [vmem:[#allocation9 + $0x30] ss:$8 sps:$4 sm:$0xff] (!%p2884_p8)   ;;  %v3220_v54 = vld [vmem:[#allocation9 + $0x44] ss:$8 sps:$4 sm:$0xff] (!%p2884_p8)  }
 0x148   : > { %v2882_v6 = vcombine.low %v561_v63, %v565_v0  ;;  %v3219_v53 = vld [vmem:[#allocation9 + $0x230] ss:$8 sps:$4 sm:$0xff] (!%p2884_p8)   ;;  %v3222_v55 = vld [vmem:[#allocation9 + $0x244] ss:$8 sps:$4 sm:$0xff] (!%p2884_p8)  }
 0x149   : > { %v3230_v61 = vld [vmem:[#allocation9 + $0x50] ss:$8 sps:$4 sm:$0xff] (!%p2884_p8)   ;;  %v3232_v63 = vld [vmem:[#allocation9 + $0x64] ss:$8 sps:$4 sm:$0xff] (!%p2884_p8)  }
 0x14a   : > { %1303 = vmatpush1.bf16.msra.mxu0 %v2816_v8  ;;  %1344 = vmatpush1.bf16.msra.mxu1 %v2818_v9  ;;  %v428_v8 = vld [vmem:[#allocation2 + $0x10] sm:$0xff]  ;;  %v427_v9 = vld [vmem:[#allocation2 + $0x8] sm:$0xff]  ;;  %v3231_v62 = vld [vmem:[#allocation9 + $0x250] ss:$8 sps:$4 sm:$0xff] (!%p2884_p8)  }
 0x14b   : > { %1304 = vmatprep.subr.bf16.mxu0 %v2825_v10  ;;  %1345 = vmatprep.subr.bf16.mxu1 %v2827_v11  ;;  %v429_v11 = vld [vmem:[#allocation2 + $0x18] sm:$0xff]  ;;  %v3234_v0 = vld [vmem:[#allocation9 + $0x264] ss:$8 sps:$4 sm:$0xff] (!%p2884_p8)  }
 0x14e   : > { %1305 = vmatpush1.bf16.msra.mxu0 %v2824_v17  ;;  %1346 = vmatpush1.bf16.msra.mxu1 %v2826_v18 }
 0x14f   : > { %1306 = vmatprep.subr.bf16.mxu0 %v2833_v19  ;;  %1347 = vmatprep.subr.bf16.mxu1 %v2835_v20 }
 0x152   : > { %1307 = vmatpush1.bf16.msra.mxu0 %v2832_v25  ;;  %1348 = vmatpush1.bf16.msra.mxu1 %v2834_v26  ;;  %v431_v25 = vld [vmem:[#allocation2 + $0x28] sm:$0xff] }
 0x153   : > { %1308 = vmatprep.subr.bf16.mxu0 %v2841_v27  ;;  %1349 = vmatprep.subr.bf16.mxu1 %v2843_v28  ;;  %v433_v27 = vld [vmem:[#allocation2 + $0x38] sm:$0xff] }
 0x156   : > { %1309 = vmatpush1.bf16.msra.mxu0 %v2840_v33  ;;  %1350 = vmatpush1.bf16.msra.mxu1 %v2842_v34 }
 0x157   : > { %1310 = vmatprep.subr.bf16.mxu0 %v2849_v35  ;;  %1351 = vmatprep.subr.bf16.mxu1 %v2851_v36 }
 0x15a   : > { %1311 = vmatpush1.bf16.msra.mxu0 %v2848_v58  ;;  %1352 = vmatpush1.bf16.msra.mxu1 %v2850_v41  ;;  %v3200_v58 = vld [vmem:[#allocation9] ss:$8 sps:$4 sm:$0xff] (!%p2884_p8)  }
 0x15b   : > { %1312 = vmatprep.subr.bf16.mxu0 %v2857_v42  ;;  %1353 = vmatprep.subr.bf16.mxu1 %v2859_v43  ;;  %v3201_v41 = vld [vmem:[#allocation9 + $0x200] ss:$8 sps:$4 sm:$0xff] (!%p2884_p8)   ;;  %v3202_v42 = vld [vmem:[#allocation9 + $0x14] ss:$8 sps:$4 sm:$0xff] (!%p2884_p8)  }
 0x15c   : > { %v3204_v43 = vld [vmem:[#allocation9 + $0x214] ss:$8 sps:$4 sm:$0xff] (!%p2884_p8)  }
 0x15e   : > { %1313 = vmatpush1.bf16.msra.mxu0 %v2856_v48  ;;  %1354 = vmatpush1.bf16.msra.mxu1 %v2858_v49  ;;  %v3212_v48 = vld [vmem:[#allocation9 + $0x20] ss:$8 sps:$4 sm:$0xff] (!%p2884_p8)  }
 0x15f   : > { %1314 = vmatprep.subr.bf16.mxu0 %v2865_v50  ;;  %1355 = vmatprep.subr.bf16.mxu1 %v2867_v51  ;;  %v3213_v49 = vld [vmem:[#allocation9 + $0x220] ss:$8 sps:$4 sm:$0xff] (!%p2884_p8)   ;;  %v3214_v50 = vld [vmem:[#allocation9 + $0x34] ss:$8 sps:$4 sm:$0xff] (!%p2884_p8)  }
 0x160   : > { %v3216_v51 = vld [vmem:[#allocation9 + $0x234] ss:$8 sps:$4 sm:$0xff] (!%p2884_p8)  }
 0x162   : > { %1315 = vmatpush1.bf16.msra.mxu0 %v2864_v56  ;;  %1356 = vmatpush1.bf16.msra.mxu1 %v2866_v57  ;;  %v3224_v56 = vld [vmem:[#allocation9 + $0x40] ss:$8 sps:$4 sm:$0xff] (!%p2884_p8)  }
 0x163   : > { %1316 = vmatprep.subr.bf16.mxu0 %v2873_v59  ;;  %1357 = vmatprep.subr.bf16.mxu1 %v2875_v60  ;;  %v3225_v57 = vld [vmem:[#allocation9 + $0x240] ss:$8 sps:$4 sm:$0xff] (!%p2884_p8)   ;;  %v3226_v59 = vld [vmem:[#allocation9 + $0x54] ss:$8 sps:$4 sm:$0xff] (!%p2884_p8)  }
 0x164   : > { %v3228_v60 = vld [vmem:[#allocation9 + $0x254] ss:$8 sps:$4 sm:$0xff] (!%p2884_p8)  }
 0x166   : > { %1317 = vmatpush1.bf16.msra.mxu0 %v2872_v1  ;;  %1358 = vmatpush1.bf16.msra.mxu1 %v2874_v2  ;;  %v3236_v1 = vld [vmem:[#allocation9 + $0x60] ss:$8 sps:$4 sm:$0xff] (!%p2884_p8)  }
 0x167   : > { %1318 = vmatprep.subr.bf16.mxu0 %v2881_v3  ;;  %1359 = vmatprep.subr.bf16.mxu1 %v2883_v4  ;;  %v3237_v2 = vld [vmem:[#allocation9 + $0x260] ss:$8 sps:$4 sm:$0xff] (!%p2884_p8)   ;;  %v3238_v3 = vld [vmem:[#allocation9 + $0x74] ss:$8 sps:$4 sm:$0xff] (!%p2884_p8)  }
 0x168   : > { %v3240_v4 = vld [vmem:[#allocation9 + $0x274] ss:$8 sps:$4 sm:$0xff] (!%p2884_p8)  }
 0x16a   : > { %1319 = vmatpush1.bf16.msra.mxu0 %v2880_v5  ;;  %1360 = vmatpush1.bf16.msra.mxu1 %v2882_v6  ;;  %v3242_v5 = vld [vmem:[#allocation9 + $0x70] ss:$8 sps:$4 sm:$0xff] (!%p2884_p8)  }
 0x16b   : > { %2236 = vmatprep.subr.bf16.mxu1 (!%p2884_p8), %v3196_v39  ;;  %2318 = vmatprep.subr.bf16.mxu0 (!%p2884_p8), %v3198_v40  ;;  %v3243_v6 = vld [vmem:[#allocation9 + $0x270] ss:$8 sps:$4 sm:$0xff] (!%p2884_p8)   ;;  %v3272_v40 = vld [vmem:[#allocation9 + $0xc0] ss:$8 sps:$4 sm:$0xff] (!%p2884_p8)  }
 0x16d   : > { %1321 = vmatmul.mubr.bf16.vlgmr.msra.gmra.mrb[4].mxu0 %v4127_v13  ;;  %1362 = vmatmul.mubr.bf16.vlgmr.msra.gmra.mrb[4].mxu1 %v4127_v13  ;;  %v430_v13 = vld [vmem:[#allocation2 + $0x20] sm:$0xff] }
 0x16e   : > { %2237 = vmatpush1.bf16.msra.mxu1 (!%p2884_p8), %v3200_v58  ;;  %2319 = vmatpush1.bf16.msra.mxu0 (!%p2884_p8), %v3201_v41  ;;  %v3273_v58 = vld [vmem:[#allocation9 + $0x2c0] ss:$8 sps:$4 sm:$0xff] (!%p2884_p8)  }
 0x16f   : > { %2238 = vmatprep.subr.bf16.mxu1 (!%p2884_p8), %v3202_v42  ;;  %2320 = vmatprep.subr.bf16.mxu0 (!%p2884_p8), %v3204_v43  ;;  %v3274_v43 = vld [vmem:[#allocation9 + $0xd4] ss:$8 sps:$4 sm:$0xff] (!%p2884_p8)  }
 0x172   : > { %2239 = vmatpush1.bf16.msra.mxu1 (!%p2884_p8), %v3206_v44  ;;  %2321 = vmatpush1.bf16.msra.mxu0 (!%p2884_p8), %v3207_v45  ;;  %v3276_v44 = vld [vmem:[#allocation9 + $0x2d4] ss:$8 sps:$4 sm:$0xff] (!%p2884_p8)   ;;  %v3278_v45 = vld [vmem:[#allocation9 + $0xd0] ss:$8 sps:$4 sm:$0xff] (!%p2884_p8)  }
 0x173   : > { %2240 = vmatprep.subr.bf16.mxu1 (!%p2884_p8), %v3208_v46  ;;  %2322 = vmatprep.subr.bf16.mxu0 (!%p2884_p8), %v3210_v47 }
 0x176   : > { %2241 = vmatpush1.bf16.msra.mxu1 (!%p2884_p8), %v3212_v48  ;;  %2323 = vmatpush1.bf16.msra.mxu0 (!%p2884_p8), %v3213_v49  ;;  %v3279_v48 = vld [vmem:[#allocation9 + $0x2d0] ss:$8 sps:$4 sm:$0xff] (!%p2884_p8)   ;;  %v3280_v49 = vld [vmem:[#allocation9 + $0xe4] ss:$8 sps:$4 sm:$0xff] (!%p2884_p8)  }
 0x177   : > { %2242 = vmatprep.subr.bf16.mxu1 (!%p2884_p8), %v3214_v50  ;;  %2324 = vmatprep.subr.bf16.mxu0 (!%p2884_p8), %v3216_v51  ;;  %v3282_v50 = vld [vmem:[#allocation9 + $0x2e4] ss:$8 sps:$4 sm:$0xff] (!%p2884_p8)   ;;  %v3284_v51 = vld [vmem:[#allocation9 + $0xe0] ss:$8 sps:$4 sm:$0xff] (!%p2884_p8)  }
 0x17a   : > { %2243 = vmatpush1.bf16.msra.mxu1 (!%p2884_p8), %v3218_v52  ;;  %2325 = vmatpush1.bf16.msra.mxu0 (!%p2884_p8), %v3219_v53  ;;  %v3285_v52 = vld [vmem:[#allocation9 + $0x2e0] ss:$8 sps:$4 sm:$0xff] (!%p2884_p8)  }
 0x17b   : > { %2244 = vmatprep.subr.bf16.mxu1 (!%p2884_p8), %v3220_v54  ;;  %2326 = vmatprep.subr.bf16.mxu0 (!%p2884_p8), %v3222_v55 }
 0x17e   : > { %2245 = vmatpush1.bf16.msra.mxu1 (!%p2884_p8), %v3224_v56  ;;  %2327 = vmatpush1.bf16.msra.mxu0 (!%p2884_p8), %v3225_v57  ;;  %v3286_v57 = vld [vmem:[#allocation9 + $0xf4] ss:$8 sps:$4 sm:$0xff] (!%p2884_p8)  }
 0x17f   : > { %2246 = vmatprep.subr.bf16.mxu1 (!%p2884_p8), %v3226_v59  ;;  %2328 = vmatprep.subr.bf16.mxu0 (!%p2884_p8), %v3228_v60  ;;  %v3288_v59 = vld [vmem:[#allocation9 + $0x2f4] ss:$8 sps:$4 sm:$0xff] (!%p2884_p8)   ;;  %v3290_v60 = vld [vmem:[#allocation9 + $0xf0] ss:$8 sps:$4 sm:$0xff] (!%p2884_p8)  }
 0x182   : > { %2247 = vmatpush1.bf16.msra.mxu1 (!%p2884_p8), %v3230_v61  ;;  %2329 = vmatpush1.bf16.msra.mxu0 (!%p2884_p8), %v3231_v62 }
 0x183   : > { %2248 = vmatprep.subr.bf16.mxu1 (!%p2884_p8), %v3232_v63  ;;  %2330 = vmatprep.subr.bf16.mxu0 (!%p2884_p8), %v3234_v0  ;;  %v3291_v63 = vld [vmem:[#allocation9 + $0x2f0] ss:$8 sps:$4 sm:$0xff] (!%p2884_p8)   ;;  %v3294_v0 = vld [vmem:[#allocation9 + $0x104] ss:$8 sps:$4 sm:$0xff] (!%p2884_p8)  }
 0x186   : > { %2249 = vmatpush1.bf16.msra.mxu1 (!%p2884_p8), %v3236_v1  ;;  %2331 = vmatpush1.bf16.msra.mxu0 (!%p2884_p8), %v3237_v2  ;;  %v3297_v1 = vld [vmem:[#allocation9 + $0x304] ss:$8 sps:$4 sm:$0xff] (!%p2884_p8)   ;;  %v3292_v2 = vld [vmem:[#allocation9 + $0x100] ss:$8 sps:$4 sm:$0xff] (!%p2884_p8)  }
 0x187   : > { %2250 = vmatprep.subr.bf16.mxu1 (!%p2884_p8), %v3238_v3  ;;  %2332 = vmatprep.subr.bf16.mxu0 (!%p2884_p8), %v3240_v4 }
 0x18a   : > { %2251 = vmatpush1.bf16.msra.mxu1 (!%p2884_p8), %v3242_v5  ;;  %2333 = vmatpush1.bf16.msra.mxu0 (!%p2884_p8), %v3243_v6  ;;  %v3295_v5 = vld [vmem:[#allocation9 + $0x300] ss:$8 sps:$4 sm:$0xff] (!%p2884_p8)   ;;  %v3300_v6 = vld [vmem:[#allocation9 + $0x114] ss:$8 sps:$4 sm:$0xff] (!%p2884_p8)  }
 0x200   : > { %v1240_v10 = vpop.f32.mrb[0].mxu0  ;;  %v1281_v14 = vpop.f32.mrb[0].mxu1 }
 0x201   : > { %v1370_v12 = vadd.f32 %v1240_v10, %v426_v7  ;;  %v1242_v15 = vpop.f32.mrb[1].mxu0  ;;  %v1372_v16 = vadd.f32 %v1281_v14, %v428_v8  ;;  %v1283_v18 = vpop.f32.mrb[1].mxu1  ;;  %v3244_v7 = vld [vmem:[#allocation9 + $0x84] ss:$8 sps:$4 sm:$0xff] (!%p2884_p8)   ;;  %v3249_v10 = vld [vmem:[#allocation9 + $0x280] ss:$8 sps:$4 sm:$0xff] (!%p2884_p8)  }
 0x202   : > { %v1371_v17 = vadd.f32 %v1242_v15, %v427_v9  ;;  %v1244_v19 = vpop.f32.mrb[2].mxu0  ;;  %v1373_v20 = vadd.f32 %v1283_v18, %v429_v11  ;;  %v1285_v21 = vpop.f32.mrb[2].mxu1  ;;  %v3246_v8 = vld [vmem:[#allocation9 + $0x284] ss:$8 sps:$4 sm:$0xff] (!%p2884_p8)   ;;  %v3248_v9 = vld [vmem:[#allocation9 + $0x80] ss:$8 sps:$4 sm:$0xff] (!%p2884_p8)   ;;  %2252 = vmatprep.subr.bf16.mxu1 (!%p2884_p8), %v3244_v7 }
 0x203   : > { %1378 = vst [vmem:[#allocation2] sm:$0xff] %v1370_v12  ;;  %v1245_v22 = vpop.f32.mrb[3].mxu0  ;;  %1380 = vst [vmem:[#allocation2 + $0x10] sm:$0xff] %v1372_v16  ;;  %v1286_v23 = vpop.f32.mrb[3].mxu1  ;;  %v3250_v11 = vld [vmem:[#allocation9 + $0x94] ss:$8 sps:$4 sm:$0xff] (!%p2884_p8)   ;;  %v1400_v12 = vlaneseq (!%p2884_p8)  ;;  %2334 = vmatprep.subr.bf16.mxu0 (!%p2884_p8), %v3246_v8  ;;  %2253 = vmatpush1.bf16.msra.mxu1 (!%p2884_p8), %v3248_v9 }
 0x204   : > { %1379 = vst [vmem:[#allocation2 + $0x8] sm:$0xff] %v1371_v17  ;;  %1381 = vst [vmem:[#allocation2 + $0x18] sm:$0xff] %v1373_v20  ;;  %v3252_v14 = vld [vmem:[#allocation9 + $0x294] ss:$8 sps:$4 sm:$0xff] (!%p2884_p8)   ;;  %v3254_v15 = vld [vmem:[#allocation9 + $0x90] ss:$8 sps:$4 sm:$0xff] (!%p2884_p8)   ;;  %2335 = vmatpush1.bf16.msra.mxu0 (!%p2884_p8), %v3249_v10  ;;  %2254 = vmatprep.subr.bf16.mxu1 (!%p2884_p8), %v3250_v11 }
 0x205   : > { %v3255_v16 = vld [vmem:[#allocation9 + $0x290] ss:$8 sps:$4 sm:$0xff] (!%p2884_p8)   ;;  %v3256_v17 = vld [vmem:[#allocation9 + $0xa4] ss:$8 sps:$4 sm:$0xff] (!%p2884_p8)   ;;  %v4194_v18 = vshrl.u32 (!%p2884_p8), %v1400_v12, 7  ;;  %2336 = vmatprep.subr.bf16.mxu0 (!%p2884_p8), %v3252_v14 }
 0x206   : > { %v3258_v19 = vld [vmem:[#allocation9 + $0x2a4] ss:$8 sps:$4 sm:$0xff] (!%p2884_p8)   ;;  %v3260_v20 = vld [vmem:[#allocation9 + $0xa0] ss:$8 sps:$4 sm:$0xff] (!%p2884_p8)   ;;  %v3262_v22 = vld [vmem:[#allocation9 + $0xb4] ss:$8 sps:$4 sm:$0xff] (!%p2884_p8)  }
 0x207   : > { %v3261_v21 = vld [vmem:[#allocation9 + $0x2a0] ss:$8 sps:$4 sm:$0xff] (!%p2884_p8)   ;;  %2255 = vmatpush1.bf16.msra.mxu1 (!%p2884_p8), %v3254_v15  ;;  %v1406_v23 = vsub.s32 (!%p2884_p8), 1, %v4194_v18  ;;  %v1402_v46 = vsub.s32 (!%p2884_p8), 0, %v4194_v18  ;;  %v1418_v47 = vsub.s32 (!%p2884_p8), 4, %v4194_v18 }
 0x208   : > { %2337 = vmatpush1.bf16.msra.mxu0 (!%p2884_p8), %v3255_v16  ;;  %2256 = vmatprep.subr.bf16.mxu1 (!%p2884_p8), %v3256_v17  ;;  %v3303_v7 = vld [vmem:[#allocation9 + $0x314] ss:$8 sps:$4 sm:$0xff] (!%p2884_p8)   ;;  %v3298_v8 = vld [vmem:[#allocation9 + $0x110] ss:$8 sps:$4 sm:$0xff] (!%p2884_p8)   ;;  %v3306_v10 = vld [vmem:[#allocation9 + $0x124] ss:$8 sps:$4 sm:$0xff] (!%p2884_p8)  }
 0x209   : > { %2338 = vmatprep.subr.bf16.mxu0 (!%p2884_p8), %v3258_v19  ;;  %v3301_v9 = vld [vmem:[#allocation9 + $0x310] ss:$8 sps:$4 sm:$0xff] (!%p2884_p8)   ;;  %v3309_v11 = vld [vmem:[#allocation9 + $0x324] ss:$8 sps:$4 sm:$0xff] (!%p2884_p8)   ;;  %v3304_v12 = vld [vmem:[#allocation9 + $0x120] ss:$8 sps:$4 sm:$0xff] (!%p2884_p8)  }
 0x20a   : > { %v1390_v53 = vld [vmem:[#allocation2] sm:$0xff] (!%p2884_p8)  ;;  %v3307_v14 = vld [vmem:[#allocation9 + $0x320] ss:$8 sps:$4 sm:$0xff] (!%p2884_p8)  }
 0x20b   : > { %2257 = vmatpush1.bf16.msra.mxu1 (!%p2884_p8), %v3260_v20  ;;  %v3312_v15 = vld [vmem:[#allocation9 + $0x134] ss:$8 sps:$4 sm:$0xff] (!%p2884_p8)   ;;  %v3310_v17 = vld [vmem:[#allocation9 + $0x130] ss:$8 sps:$4 sm:$0xff] (!%p2884_p8)   ;;  %v3318_v20 = vld [vmem:[#allocation9 + $0x144] ss:$8 sps:$4 sm:$0xff] (!%p2884_p8)  }
 0x20c   : > { %2339 = vmatpush1.bf16.msra.mxu0 (!%p2884_p8), %v3261_v21  ;;  %2258 = vmatprep.subr.bf16.mxu1 (!%p2884_p8), %v3262_v22  ;;  %v3315_v16 = vld [vmem:[#allocation9 + $0x334] ss:$8 sps:$4 sm:$0xff] (!%p2884_p8)   ;;  %v3313_v19 = vld [vmem:[#allocation9 + $0x330] ss:$8 sps:$4 sm:$0xff] (!%p2884_p8)   ;;  %v3321_v21 = vld [vmem:[#allocation9 + $0x344] ss:$8 sps:$4 sm:$0xff] (!%p2884_p8)  }
 0x20d   : > { %v3316_v22 = vld [vmem:[#allocation9 + $0x140] ss:$8 sps:$4 sm:$0xff] (!%p2884_p8)  }
 0x23e   : > { %1389 = sbr.rel (%p2884_p8) target bundleno = 1414 (0x586), region = 84 }
 0x240   : > { %v1322_v26 = vpop.f32.mrb[4].mxu0  ;;  %v1363_v29 = vpop.f32.mrb[4].mxu1 }
 0x241   : > { %v1374_v28 = vadd.f32 %v1322_v26, %v430_v13  ;;  %v1324_v30 = vpop.f32.mrb[5].mxu0  ;;  %v1376_v31 = vadd.f32 %v1363_v29, %v432_v24  ;;  %v1365_v33 = vpop.f32.mrb[5].mxu1  ;;  %v1422_v13 = vsub.s32 (!%p2884_p8), 5, %v4194_v18  ;;  %v3264_v24 = vld [vmem:[#allocation9 + $0x2b4] ss:$8 sps:$4 sm:$0xff] (!%p2884_p8)   ;;  %v1391_v26 = vld [vmem:[#allocation2 + $0x8] sm:$0xff] (!%p2884_p8) }
 0x242   : > { %v1375_v32 = vadd.f32 %v1324_v30, %v431_v25  ;;  %v1326_v34 = vpop.f32.mrb[6].mxu0  ;;  %v1377_v35 = vadd.f32 %v1365_v33, %v433_v27  ;;  %v1367_v36 = vpop.f32.mrb[6].mxu1  ;;  %v3266_v25 = vld [vmem:[#allocation9 + $0xb0] ss:$8 sps:$4 sm:$0xff] (!%p2884_p8)   ;;  %v1410_v27 = vsub.s32 (!%p2884_p8), 2, %v4194_v18  ;;  %2340 = vmatprep.subr.bf16.mxu0 (!%p2884_p8), %v3264_v24  ;;  %v1414_v24 = vsub.s32 (!%p2884_p8), 3, %v4194_v18 }
 0x243   : > { %1382 = vst [vmem:[#allocation2 + $0x20] sm:$0xff] %v1374_v28  ;;  %v1327_v37 = vpop.f32.mrb[7].mxu0  ;;  %1384 = vst [vmem:[#allocation2 + $0x30] sm:$0xff] %v1376_v31  ;;  %v1368_v38 = vpop.f32.mrb[7].mxu1  ;;  %v1426_v28 = vsub.s32 (!%p2884_p8), 6, %v4194_v18  ;;  %v4200_v29 = vld [vmem:[#allocation8] sm:$0xff] (!%p2884_p8)  ;;  %2259 = vmatpush1.bf16.msra.mxu1 (!%p2884_p8), %v3266_v25 }
 0x244   : > { %1383 = vst [vmem:[#allocation2 + $0x28] sm:$0xff] %v1375_v32  ;;  %1385 = vst [vmem:[#allocation2 + $0x38] sm:$0xff] %v1377_v35  ;;  %v3267_v30 = vld [vmem:[#allocation9 + $0x2b0] ss:$8 sps:$4 sm:$0xff] (!%p2884_p8)   ;;  %v3268_v31 = vld [vmem:[#allocation9 + $0xc4] ss:$8 sps:$4 sm:$0xff] (!%p2884_p8)   ;;  %v1407_v32 = vrot.slane (!%p2884_p8), %v4200_v29, %v1406_v23  ;;  %v1423_v34 = vrot.slane (!%p2884_p8), %v4200_v29, %v1422_v13  ;;  %v4207_v38 = vrot.slane (!%p2884_p8), %v4200_v29, %v1410_v27 }
 0x245   : > { %v3270_v35 = vld [vmem:[#allocation9 + $0x2c4] ss:$8 sps:$4 sm:$0xff]   ;;  %v4210_v39 = vrot.slane %v4200_v29, %v1426_v28  ;;  %2341 = vmatpush1.bf16.msra.mxu0 %v3267_v30  ;;  %2260 = vmatprep.subr.bf16.mxu1 %v3268_v31  ;;  %v1403_v54 = vrot.slane %v4200_v29, %v1402_v46  ;;  %v1419_v55 = vrot.slane %v4200_v29, %v1418_v47  ;;  %v3319_v13 = vld [vmem:[#allocation9 + $0x340] ss:$8 sps:$4 sm:$0xff]   ;;  %v1430_v25 = vsub.s32 7, %v4194_v18 }
 0x246   : > { %v1441_v36 = vadd.f32 %v1407_v32, %v1391_v26  ;;  %2342 = vmatprep.subr.bf16.mxu0 %v3270_v35  ;;  %v3324_v26 = vld [vmem:[#allocation9 + $0x154] ss:$8 sps:$4 sm:$0xff]   ;;  %v3322_v28 = vld [vmem:[#allocation9 + $0x150] ss:$8 sps:$4 sm:$0xff]   ;;  %v1415_v31 = vrot.slane %v4200_v29, %v1414_v24  ;;  %v3328_v35 = vld [vmem:[#allocation9 + $0x160] ss:$8 sps:$4 sm:$0xff]  }
 0x247   : > { %2261 = vmatpush1.bf16.msra.mxu1 %v3272_v40  ;;  %v1440_v61 = vadd.f32 %v1403_v54, %v1390_v53  ;;  %v3327_v27 = vld [vmem:[#allocation9 + $0x354] ss:$8 sps:$4 sm:$0xff]   ;;  %v3325_v30 = vld [vmem:[#allocation9 + $0x350] ss:$8 sps:$4 sm:$0xff]   ;;  %v1431_v32 = vrot.slane %v4200_v29, %v1430_v25 }
 0x248   : > { %v1449_v41 = vpack.c.bf16 %v1441_v36, %v1441_v36  ;;  %2262 = vmatprep.subr.bf16.mxu1 %v3274_v43  ;;  %v3331_v36 = vld [vmem:[#allocation9 + $0x360] ss:$8 sps:$4 sm:$0xff]   ;;  %v3339_v43 = vld [vmem:[#allocation9 + $0x374] ss:$8 sps:$4 sm:$0xff]   ;;  %v3337_v29 = vld [vmem:[#allocation9 + $0x370] ss:$8 sps:$4 sm:$0xff]  }
 0x249   : > { %2343 = vmatpush1.bf16.msra.mxu0 %v3273_v58  ;;  %v1448_v3 = vpack.c.bf16 %v1440_v61, %v1440_v61  ;;  %v3336_v58 = vld [vmem:[#allocation9 + $0x174] ss:$8 sps:$4 sm:$0xff]   ;;  %v3346_v54 = vld [vmem:[#allocation9 + $0x190] ss:$8 sps:$4 sm:$0xff]  }
 0x24a   : > { %2268 = vmatprep.mubr.bf16.mxu1 %v1449_v41  ;;  %2344 = vmatprep.subr.bf16.mxu0 %v3276_v44  ;;  %v1394_v56 = vld [vmem:[#allocation2 + $0x20] sm:$0xff] }
 0x24b   : > { %v1395_v33 = vld [vmem:[#allocation2 + $0x28] sm:$0xff]  ;;  %2263 = vmatpush1.bf16.msra.mxu1 %v3278_v45  ;;  %v1444_v62 = vadd.f32 %v1419_v55, %v1394_v56  ;;  %v1397_v40 = vld [vmem:[#allocation2 + $0x38] sm:$0xff] }
 0x24c   : > { %v1445_v37 = vadd.f32 %v1423_v34, %v1395_v33  ;;  %2264 = vmatprep.subr.bf16.mxu1 %v3280_v49  ;;  %v3330_v33 = vld [vmem:[#allocation9 + $0x164] ss:$8 sps:$4 sm:$0xff]   ;;  %v3334_v44 = vld [vmem:[#allocation9 + $0x170] ss:$8 sps:$4 sm:$0xff]   ;;  %v3351_v53 = vld [vmem:[#allocation9 + $0x394] ss:$8 sps:$4 sm:$0xff]  }
 0x24d   : > { %2345 = vmatpush1.bf16.msra.mxu0 %v3279_v48  ;;  %v1452_v4 = vpack.c.bf16 %v1444_v62, %v1444_v62  ;;  %v3333_v34 = vld [vmem:[#allocation9 + $0x364] ss:$8 sps:$4 sm:$0xff]   ;;  %v3349_v55 = vld [vmem:[#allocation9 + $0x390] ss:$8 sps:$4 sm:$0xff]   ;;  %v3360_v61 = vld [vmem:[#allocation9 + $0x1b4] ss:$8 sps:$4 sm:$0xff]  }
 0x24e   : > { %v1453_v42 = vpack.c.bf16 %v1445_v37, %v1445_v37  ;;  %2346 = vmatprep.subr.bf16.mxu0 %v3282_v50  ;;  %v1393_v37 = vld [vmem:[#allocation2 + $0x18] sm:$0xff]  ;;  %v3342_v48 = vld [vmem:[#allocation9 + $0x184] ss:$8 sps:$4 sm:$0xff]   ;;  %v3340_v50 = vld [vmem:[#allocation9 + $0x180] ss:$8 sps:$4 sm:$0xff]  }
 0x24f   : > { %2265 = vmatpush1.bf16.msra.mxu1 %v3284_v51  ;;  %v1443_v41 = vadd.f32 %v1415_v31, %v1393_v37  ;;  %v3345_v49 = vld [vmem:[#allocation9 + $0x384] ss:$8 sps:$4 sm:$0xff]   ;;  %v3343_v51 = vld [vmem:[#allocation9 + $0x380] ss:$8 sps:$4 sm:$0xff]   ;;  %v3363_v62 = vld [vmem:[#allocation9 + $0x3b4] ss:$8 sps:$4 sm:$0xff]  }
 0x250   : > { %2350 = vmatprep.mubr.bf16.mxu0 %v1453_v42  ;;  %2266 = vmatprep.subr.bf16.mxu1 %v3286_v57  ;;  %v1447_v42 = vadd.f32 %v1431_v32, %v1397_v40  ;;  %v3354_v56 = vld [vmem:[#allocation9 + $0x1a4] ss:$8 sps:$4 sm:$0xff]   ;;  %v3395_v31 = vld [vmem:[#allocation12 + $0x18] sm:$0xff]   ;;  %v3401_v37 = vld [vmem:[#allocation12 + $0x30] sm:$0xff]  }
 0x251   : > { %2347 = vmatpush1.bf16.msra.mxu0 %v3285_v52  ;;  %v1451_v45 = vpack.c.bf16 %v1443_v41, %v1443_v41  ;;  %v3348_v52 = vld [vmem:[#allocation9 + $0x194] ss:$8 sps:$4 sm:$0xff]   ;;  %v3357_v57 = vld [vmem:[#allocation9 + $0x3a4] ss:$8 sps:$4 sm:$0xff]   ;;  %v1584_v41 = vld [vmem:[#allocation11] sm:$0x3] }
 0x252   : > { %2348 = vmatprep.subr.bf16.mxu0 %v3288_v59  ;;  %v1455_v47 = vpack.c.bf16 %v1447_v42, %v1447_v42  ;;  %v3352_v59 = vld [vmem:[#allocation9 + $0x1a0] ss:$8 sps:$4 sm:$0xff]   ;;  %v1589_v42 = vrot.slane %v1584_v41, %v1402_v46 }
 0x253   : > { %2267 = vmatpush1.bf16.msra.mxu1 %v3290_v60  ;;  %v3355_v60 = vld [vmem:[#allocation9 + $0x3a0] ss:$8 sps:$4 sm:$0xff]  }
 0x254   : > { %2277 = vmatprep.subr.bf16.mxu1 %v3294_v0  ;;  %v3361_v0 = vld [vmem:[#allocation9 + $0x3b0] ss:$8 sps:$4 sm:$0xff]   ;;  %v3396_v32 = vld [vmem:[#allocation12 + $0x60] sm:$0xff]  }
 0x255   : > { %2349 = vmatpush1.bf16.msra.mxu0 %v3291_v63  ;;  %v3358_v63 = vld [vmem:[#allocation9 + $0x1b0] ss:$8 sps:$4 sm:$0xff]   ;;  %v3013_v46 = vld [vmem:[#allocation14] ss:$0 sm:$0xff] }
 0x256   : > { %2359 = vmatprep.subr.bf16.mxu0 %v3297_v1  ;;  %2269 = vmatmul.mubr.bf16.vlgmr.msra.gmra.mrb[0].mxu1 %v1448_v3  ;;  %v3366_v1 = vld [vmem:[#allocation9 + $0x1c4] ss:$8 sps:$4 sm:$0xff]   ;;  %v3364_v3 = vld [vmem:[#allocation9 + $0x1c0] ss:$8 sps:$4 sm:$0xff]  }
 0x257   : > { %2278 = vmatpush1.bf16.msra.mxu1 %v3292_v2  ;;  %2309 = vmatprep.mubr.bf16.mxu1 %v1451_v45  ;;  %v3369_v2 = vld [vmem:[#allocation9 + $0x3c4] ss:$8 sps:$4 sm:$0xff]   ;;  %v3402_v40 = vld [vmem:[#allocation12 + $0x78] sm:$0xff]  }
 0x258   : > { %2351 = vmatmul.mubr.bf16.vlgmr.msra.gmra.mrb[0].mxu0 %v1452_v4  ;;  %2279 = vmatprep.subr.bf16.mxu1 %v3300_v6  ;;  %v3367_v4 = vld [vmem:[#allocation9 + $0x3c0] ss:$8 sps:$4 sm:$0xff]   ;;  %v3375_v6 = vld [vmem:[#allocation9 + $0x3d4] ss:$8 sps:$4 sm:$0xff]  }
 0x259   : > { %2360 = vmatpush1.bf16.msra.mxu0 %v3295_v5  ;;  %2391 = vmatprep.mubr.bf16.mxu0 %v1455_v47  ;;  %v3372_v5 = vld [vmem:[#allocation9 + $0x1d4] ss:$8 sps:$4 sm:$0xff]  }
 0x25a   : > { %2361 = vmatprep.subr.bf16.mxu0 %v3303_v7  ;;  %v3370_v7 = vld [vmem:[#allocation9 + $0x1d0] ss:$8 sps:$4 sm:$0xff]  }
 0x25b   : > { %2280 = vmatpush1.bf16.msra.mxu1 %v3298_v8  ;;  %v3373_v8 = vld [vmem:[#allocation9 + $0x3d0] ss:$8 sps:$4 sm:$0xff]  }
 0x25c   : > { %2281 = vmatprep.subr.bf16.mxu1 %v3306_v10  ;;  %v3381_v10 = vld [vmem:[#allocation9 + $0x3e4] ss:$8 sps:$4 sm:$0xff]  }
 0x25d   : > { %2362 = vmatpush1.bf16.msra.mxu0 %v3301_v9  ;;  %v3378_v9 = vld [vmem:[#allocation9 + $0x1e4] ss:$8 sps:$4 sm:$0xff]  }
 0x25e   : > { %2363 = vmatprep.subr.bf16.mxu0 %v3309_v11  ;;  %v3376_v11 = vld [vmem:[#allocation9 + $0x1e0] ss:$8 sps:$4 sm:$0xff]  }
 0x25f   : > { %2282 = vmatpush1.bf16.msra.mxu1 %v3304_v12  ;;  %v3379_v12 = vld [vmem:[#allocation9 + $0x3e0] ss:$8 sps:$4 sm:$0xff]  }
 0x260   : > { %2283 = vmatprep.subr.bf16.mxu1 %v3312_v15  ;;  %v1396_v15 = vld [vmem:[#allocation2 + $0x30] sm:$0xff] }
 0x261   : > { %2364 = vmatpush1.bf16.msra.mxu0 %v3307_v14  ;;  %v1392_v14 = vld [vmem:[#allocation2 + $0x10] sm:$0xff] }
 0x262   : > { %2365 = vmatprep.subr.bf16.mxu0 %v3315_v16  ;;  %v3384_v16 = vld [vmem:[#allocation9 + $0x1f4] ss:$8 sps:$4 sm:$0xff]  }
 0x263   : > { %2284 = vmatpush1.bf16.msra.mxu1 %v3310_v17  ;;  %v3387_v17 = vld [vmem:[#allocation9 + $0x3f4] ss:$8 sps:$4 sm:$0xff]  }
 0x264   : > { %2285 = vmatprep.subr.bf16.mxu1 %v3318_v20  ;;  %v1446_v20 = vadd.f32 %v4210_v39, %v1396_v15  ;;  %v3392_v39 = vld [vmem:[#allocation12 + $0x50] sm:$0xff]  }
 0x265   : > { %2366 = vmatpush1.bf16.msra.mxu0 %v3313_v19  ;;  %v1442_v19 = vadd.f32 %v4207_v38, %v1392_v14  ;;  %v3391_v38 = vld [vmem:[#allocation12 + $0x8] sm:$0xff]  }
 0x266   : > { %2367 = vmatprep.subr.bf16.mxu0 %v3321_v21  ;;  %v3382_v21 = vld [vmem:[#allocation9 + $0x1f0] ss:$8 sps:$4 sm:$0xff]   ;;  %v1454_v25 = vpack.c.bf16 %v1446_v20, %v1446_v20 }
 0x267   : > { %2286 = vmatpush1.bf16.msra.mxu1 %v3316_v22  ;;  %v3385_v22 = vld [vmem:[#allocation9 + $0x3f0] ss:$8 sps:$4 sm:$0xff]   ;;  %v1450_v24 = vpack.c.bf16 %v1442_v19, %v1442_v19 }
 0x268   : > { %2287 = vmatprep.subr.bf16.mxu1 %v3324_v26  ;;  %v3389_v26 = vld [vmem:[#allocation12] sm:$0xff]  }
 0x269   : > { %2368 = vmatpush1.bf16.msra.mxu0 %v3319_v13  ;;  %v3388_v13 = vld [vmem:[#allocation12 + $0x40] sm:$0xff]  }
 0x26a   : > { %2369 = vmatprep.subr.bf16.mxu0 %v3327_v27  ;;  %v3390_v27 = vld [vmem:[#allocation12 + $0x48] sm:$0xff]  }
 0x26b   : > { %2288 = vmatpush1.bf16.msra.mxu1 %v3322_v28  ;;  %v3393_v28 = vld [vmem:[#allocation12 + $0x10] sm:$0xff]  }
 0x26c   : > { %2289 = vmatprep.subr.bf16.mxu1 %v3330_v33  ;;  %v3397_v33 = vld [vmem:[#allocation12 + $0x20] sm:$0xff]  }
 0x26d   : > { %2370 = vmatpush1.bf16.msra.mxu0 %v3325_v30  ;;  %v3394_v30 = vld [vmem:[#allocation12 + $0x58] sm:$0xff]  }
 0x26e   : > { %2371 = vmatprep.subr.bf16.mxu0 %v3333_v34  ;;  %v3398_v34 = vld [vmem:[#allocation12 + $0x68] sm:$0xff]  }
 0x26f   : > { %2290 = vmatpush1.bf16.msra.mxu1 %v3328_v35  ;;  %v3399_v35 = vld [vmem:[#allocation12 + $0x28] sm:$0xff]  }
 0x270   : > { %2291 = vmatprep.subr.bf16.mxu1 %v3336_v58  ;;  %v3403_v58 = vld [vmem:[#allocation12 + $0x38] sm:$0xff]  }
 0x271   : > { %2372 = vmatpush1.bf16.msra.mxu0 %v3331_v36  ;;  %v3400_v36 = vld [vmem:[#allocation12 + $0x70] sm:$0xff]  }
 0x272   : > { %2373 = vmatprep.subr.bf16.mxu0 %v3339_v43  ;;  %v1593_v43 = vrot.slane %v1584_v41, %v1406_v23 }
 0x273   : > { %2292 = vmatpush1.bf16.msra.mxu1 %v3334_v44 }
 0x274   : > { %2293 = vmatprep.subr.bf16.mxu1 %v3342_v48 }
 0x275   : > { %2374 = vmatpush1.bf16.msra.mxu0 %v3337_v29 }
 0x276   : > { %2375 = vmatprep.subr.bf16.mxu0 %v3345_v49 }
 0x277   : > { %2294 = vmatpush1.bf16.msra.mxu1 %v3340_v50 }
 0x278   : > { %2295 = vmatprep.subr.bf16.mxu1 %v3348_v52 }
 0x279   : > { %2376 = vmatpush1.bf16.msra.mxu0 %v3343_v51 }
 0x27a   : > { %2377 = vmatprep.subr.bf16.mxu0 %v3351_v53 }
 0x27b   : > { %2296 = vmatpush1.bf16.msra.mxu1 %v3346_v54 }
 0x27c   : > { %2297 = vmatprep.subr.bf16.mxu1 %v3354_v56 }
 0x27d   : > { %2378 = vmatpush1.bf16.msra.mxu0 %v3349_v55 }
 0x27e   : > { %2379 = vmatprep.subr.bf16.mxu0 %v3357_v57 }
 0x27f   : > { %2298 = vmatpush1.bf16.msra.mxu1 %v3352_v59 }
 0x280   : > { %2299 = vmatprep.subr.bf16.mxu1 %v3360_v61 }
 0x281   : > { %2380 = vmatpush1.bf16.msra.mxu0 %v3355_v60 }
 0x282   : > { %2381 = vmatprep.subr.bf16.mxu0 %v3363_v62 }
 0x283   : > { %2300 = vmatpush1.bf16.msra.mxu1 %v3358_v63 }
 0x284   : > { %2301 = vmatprep.subr.bf16.mxu1 %v3366_v1 }
 0x285   : > { %2382 = vmatpush1.bf16.msra.mxu0 %v3361_v0 }
 0x286   : > { %2383 = vmatprep.subr.bf16.mxu0 %v3369_v2 }
 0x287   : > { %2302 = vmatpush1.bf16.msra.mxu1 %v3364_v3 }
 0x288   : > { %2303 = vmatprep.subr.bf16.mxu1 %v3372_v5 }
 0x289   : > { %2384 = vmatpush1.bf16.msra.mxu0 %v3367_v4 }
 0x28a   : > { %2385 = vmatprep.subr.bf16.mxu0 %v3375_v6 }
 0x28b   : > { %2304 = vmatpush1.bf16.msra.mxu1 %v3370_v7 }
 0x28c   : > { %2305 = vmatprep.subr.bf16.mxu1 %v3378_v9 }
 0x28d   : > { %2386 = vmatpush1.bf16.msra.mxu0 %v3373_v8 }
 0x28e   : > { %2387 = vmatprep.subr.bf16.mxu0 %v3381_v10 }
 0x28f   : > { %2306 = vmatpush1.bf16.msra.mxu1 %v3376_v11 }
 0x290   : > { %2307 = vmatprep.subr.bf16.mxu1 %v3384_v16 }
 0x291   : > { %2388 = vmatpush1.bf16.msra.mxu0 %v3379_v12 }
 0x292   : > { %2389 = vmatprep.subr.bf16.mxu0 %v3387_v17 }
 0x293   : > { %2308 = vmatpush1.bf16.msra.mxu1 %v3382_v21 }
 0x294   : > { %3037 = vmatprep.subr.bf16.mxu1 %v3388_v13 }
 0x295   : > { %2390 = vmatpush1.bf16.msra.mxu0 %v3385_v22 }
 0x296   : > { %2310 = vmatmul.mubr.bf16.vlgmr.msra.gmra.mrb[0].mxu1 %v1450_v24 }
 0x297   : > { %3038 = vmatpush3.bf16.msra.mxu1 %v3389_v26 }
 0x298   : > { %2392 = vmatmul.mubr.bf16.vlgmr.msra.gmra.mrb[0].mxu0 %v1454_v25  ;;  %3039 = vmatprep.subr.bf16.mxu1 %v3390_v27 }
 0x29b   : > { %3040 = vmatpush3.bf16.msra.mxu1 %v3391_v38 }
 0x29c   : > { %3041 = vmatprep.subr.bf16.mxu1 %v3392_v39 }
 0x29f   : > { %3042 = vmatpush3.bf16.msra.mxu1 %v3393_v28 }
 0x2a0   : > { %3043 = vmatprep.subr.bf16.mxu1 %v3394_v30 }
 0x2a3   : > { %3044 = vmatpush3.bf16.msra.mxu1 %v3395_v31 }
 0x2a4   : > { %3045 = vmatprep.subr.bf16.mxu1 %v3396_v32 }
 0x2a7   : > { %3046 = vmatpush3.bf16.msra.mxu1 %v3397_v33 }
 0x2a8   : > { %3047 = vmatprep.subr.bf16.mxu1 %v3398_v34 }
 0x2ab   : > { %3048 = vmatpush3.bf16.msra.mxu1 %v3399_v35 }
 0x2ac   : > { %3049 = vmatprep.subr.bf16.mxu1 %v3400_v36 }
 0x2af   : > { %3050 = vmatpush3.bf16.msra.mxu1 %v3401_v37 }
 0x2b0   : > { %3051 = vmatprep.subr.bf16.mxu1 %v3402_v40 }
 0x2b3   : > { %3052 = vmatpush3.bf16.msra.mxu1 %v3403_v58 }
 0x369   : > { %v2311_v44 = vpop.f32.mrb[0].mxu1 }
 0x36a   : > { %v3059_v47 = vadd.f32 %v2311_v44, %v1589_v42  ;;  %v2313_v29 = vpop.f32.mrb[1].mxu1 }
 0x36b   : > { %v2393_v45 = vpop.f32.mrb[0].mxu0  ;;  %v3061_v49 = vadd.f32 %v2313_v29, %v1593_v43  ;;  %v2315_v50 = vpop.f32.mrb[2].mxu1 }
 0x36c   : > { %v2395_v48 = vpop.f32.mrb[1].mxu0  ;;  %v3060_v52 = vadd.f32 %v3059_v47, %v2393_v45  ;;  %v2316_v53 = vpop.f32.mrb[3].mxu1 }
 0x36d   : > { %v2397_v51 = vpop.f32.mrb[2].mxu0  ;;  %v3062_v55 = vadd.f32 %v3061_v49, %v2395_v48 }
 0x36e   : > { %v2398_v54 = vpop.f32.mrb[3].mxu0  ;;  %v2400_v56 = vmax.f32 %v3060_v52, 0.0 }
 0x36f   : > { %v2401_v57 = vmax.f32 %v3062_v55, 0.0 }
 0x370   : > { %v2402_v60 = vpack.c.bf16 %v2400_v56, %v2400_v56 }
 0x371   : > { %v2403_v59 = vpack.c.bf16 %v2401_v57, %v2401_v57 }
 0x373   : > { %2571 = vmatprep.mubr.bf16.mxu1 %v2403_v59 }
 0x374   : > { %2572 = vmatmul.mubr.bf16.vlgmr.msra.gmra.mrb[4].mxu1 %v2402_v60 }
 0x447   : > { %v3053_v18 = vpop.f32.mrb[4].mxu1 }
 0x448   : > { %v3054_v23 = vpop.f32.mrb[5].mxu1 }
 0x449   : > { %v3055_v61 = vadd.f32 %v3054_v23, %v3053_v18  ;;  %v3056_v62 = vpop.f32.mrb[6].mxu1 }
 0x44a   : > { %v3057_v63 = vpop.f32.mrb[7].mxu1 }
 0x44b   : > { %v2574_v0 = vadd.f32 %v3055_v61, %v3013_v46 }
 0x44d   : > { %2579 = vmax.xlane.f32.xlu0 %v2574_v0 }
 0x4da   : > { %v2580_v1 = vpop.xlane.xlu0 %2579 }
 0x4db   : > { %v2581_v2 = vsub.f32 %v2574_v0, %v2580_v1 }
 0x4dd   : > { %v2582_v3 = vmul.f32 1.442695, %v2581_v2 }
 0x4df   : > { %3404 = vpow2.f32 %v2582_v3 }
 0x4e9   : > { %v3405_v4 = vpop.eup %3404 }
 0x4ea   : > { %2584 = vadd.xlane.f32.xlu0 %v3405_v4 }
 0x577   : > { %v2585_v5 = vpop.xlane.xlu0 %2584 }
 0x578   : > { %3406 = vrcp.f32 %v2585_v5 }
 0x582   : > { %v3407_v6 = vpop.eup %3406 }
 0x583   : > { %v2587_v7 = vmul.f32 %v3407_v6, %v3405_v4 }
 0x585   : > { %2588 = vst [vmem:[#allocation15] sm:$0xff] %v2587_v7 }
 0x586 PF: > { %p3133_p4 = scmp.eq.s32.totalorder %s3792_s30, 2  ;;  %s3720_s27 = smov [#allocation15]  }
 0x587   : > { %s2598_s8 = sshll.u32 %s3720_s27, 4  ;;  %s2599_s8 = int_to_ptr.vmem [resolvable:$true] %s2598_s8 }
 0x588   : > { %s3608_s20 = scalar_lea.vmem %s2599_s8, 128  ;;  %p3615_p11 = scmp.lt.s32.totalorder %s2599_s8, %s2599_s8 }
 0x589   : > { %p3609_p9 = scmp.ne.s32.totalorder %s2599_s8, %s3608_s20  ;;  %p3616_p0 = scmp.lt.s32.totalorder %s3608_s20, %s3608_s20 }
 0x58b   : > { %p3610_p3 = pnand %p3609_p9, %p3133_p4  ;;  %p3617_p5 = por %p3616_p0, %p3615_p11 }
 0x58d   : > { %p3611_p10 = pneg %p3610_p3 }
 0x58f   : > { %p3618_p1 = pnand %p3617_p5, %p3611_p10 }
 0x591   : > { %3621 = shalt.err (!%p3618_p1)
}
 0x592   : > { %s4299_s16 = sld [smem:[#allocation24_spill]] }
 0x598   : > { %s3622_s23 = scalar_lea.hbm %s4299_s16, 128 }
 0x599   : > { %p3623_p13 = scmp.ne.s32.totalorder %s4299_s16, %s3622_s23  ;;  %p3628_p6 = scmp.lt.u32.totalorder %s3622_s23, %s4299_s16 }
 0x59b   : > { %p3624_p2 = pnand %p3623_p13, %p3133_p4 }
 0x59d   : > { %p3625_p7 = pneg %p3624_p2 }
 0x59f   : > { %p3630_p12 = pnand %p3628_p6, %p3625_p7 }
 0x5a1   : > { %3633 = shalt.err (!%p3630_p12)
}
 0x5a2   : > { %3096 = dma.vmem_to_hbm [thread:$0]  (%p3133_p4), %s2599_s8, 128, %s4299_s16, [#allocation5]  }
 0x5a3   : > { %3679 = dma.done.wait (%p3133_p4), [#allocation5], 128  }
 0x5a4   : > { %3681 = vsyncadd (%p3133_p4), [#allocation5], 4294967168 }
 0x5a5 PF: > { %s26_s29 = sadd.s32 1, %s3704_s29   ;;  %s4300_s24 = smov %s3688_s25 }
 0x5a6   : > { %p23_p8 = scmp.ge.s32.totalorder %s26_s29, 5   ;;  %s4301_s25 = smov %s3692_s26 }
 0x5a7   : > { %s4302_s26 = smov %s3942_s3  ;;  %s4303_s27 = smov %s3700_s28 }
 0x5a8   : > { %s4304_s28 = smov %s4306_s21  ;;  %25 = sbr.rel (!%p23_p8) target bundleno = 13 (0xd), region = 127 }
 0x5af   :  { %2611 = vsyncpa [#allocation4], 1 }
 0x5b0   :  { %2613 = vsyncpa [#allocation4 + $0x1], 1 }
 0x5b1   :  { %2614 = vsyncpa [#allocation7], 1 }
 0x5b2   :  { %2616 = vsyncpa [#allocation7 + $0x1], 1 }
 0x5b3   :  { %2617 = vsyncpa [#allocation10], 1 }
 0x5b4   :  { %2618 = vsyncpa [#allocation13], 1 }
 0x5b5   :  { %2619 = vsyncpa [#allocation5], 1 }
 0x5b6   :  { %2621 = vsyncpa [#allocation5 + $0x1], 1 }

</bundles_post_ra>
